<compile_context>
chip_gen: v6e
topology: v6e:2x2x1
jax: 0.10.0
libtpu: 0.0.40
codegen_flags: <defaults>
</compile_context>

<pallas_src>
import functools

import numpy as np

import jax
import jax.numpy as jnp
from jax.experimental import pallas as pl
from jax.experimental.pallas import tpu as pltpu

LN_EPS = 1e-5  # PyTorch nn.LayerNorm default


# ---------------------------------------------------------------------------
# Fused LayerNorm + (per-row-selected) Linear Pallas kernel
# ---------------------------------------------------------------------------
def _fused_ln_matmul_kernel(n_seg, x_ref, seg_ref, w_ref, b_ref, o_ref):
    """LayerNorm(last dim; affine folded into W/b) + weight-set-selected Linear.

    x_ref  : (tm, Din)            input rows
    seg_ref: (tm, 1)  int32       weight-set id per row (-1 for padding rows)
    w_ref  : (n_seg, Din, Dout)   folded weights  (gamma folded in)
    b_ref  : (n_seg, 1, Dout)     folded biases   (beta@W + bias), zero-padded
    o_ref  : (tm, Dout)           lane-dense output
    """
    x = x_ref[...].astype(jnp.float32)
    mean = jnp.mean(x, axis=-1, keepdims=True)
    var = jnp.mean((x - mean) ** 2, axis=-1, keepdims=True)     # biased var (PyTorch)
    xn = (x - mean) * jax.lax.rsqrt(var + LN_EPS)

    seg = seg_ref[...]                                          # (tm, 1) int32
    acc = jnp.zeros(o_ref.shape, jnp.float32)
    # Static unroll over weight sets; each is a tiny MXU matmul and the correct
    # one is selected per row.  Padding rows (seg == -1) stay exactly zero.
    # NOTE: if Din/Dout ever scale to production sizes, switch to a K-tiled
    # 'arbitrary' grid axis with an f32 VMEM accumulator instead of keeping the
    # whole weight stack resident (v7x only has 64 MiB VMEM), and feed the MXU
    # bf16 operands on v6e/v7x.
    for s in range(n_seg):
        y = jnp.dot(xn, w_ref[s], preferred_element_type=jnp.float32) + b_ref[s]
        acc = jnp.where(seg == s, y, acc)
    o_ref[...] = acc.astype(o_ref.dtype)


def fused_ln_linear(segments, *, tm=128):
    """Run LayerNorm+Linear for several branches in ONE pallas_call.

    segments: list of dicts {'x': (m_i, Din), 'w': (Din, dout_i), 'b': (dout_i,)}
              (LN affine already folded into w/b).  All segments share Din.
    Returns a list of (m_i, dout_i) float32 outputs (same order as `segments`).
    """
    din = int(segments[0]["x"].shape[-1])
    assert all(int(s["x"].shape[-1]) == din for s in segments)
    n_seg = len(segments)
    sizes = [int(s["x"].shape[0]) for s in segments]
    douts = [int(s["w"].shape[1]) for s in segments]
    dout_pad = ((max(douts) + 127) // 128) * 128        # lane-dense output width
    m_total = sum(sizes)
    mp = ((m_total + tm - 1) // tm) * tm                # pad rows once, globally

    x_all = jnp.concatenate([s["x"] for s in segments], axis=0)
    if mp != m_total:
        x_all = jnp.pad(x_all, ((0, mp - m_total), (0, 0)))

    # Per-row weight-set id (static shapes -> build with numpy, no device work).
    seg_np = np.zeros((mp, 1), np.int32)
    off = 0
    for i, m in enumerate(sizes):
        seg_np[off:off + m, 0] = i
        off += m
    seg_np[off:, 0] = -1                                # padding rows -> exact zeros
    seg_ids = jnp.asarray(seg_np)

    w_stack = jnp.stack([
        jnp.pad(s["w"].astype(jnp.float32),
                ((0, 0), (0, dout_pad - int(s["w"].shape[1]))))
        for s in segments])                             # (n_seg, Din, Dp)
    b_stack = jnp.stack([
        jnp.pad(s["b"].astype(jnp.float32),
                ((0, dout_pad - int(s["b"].shape[0])),)).reshape(1, dout_pad)
        for s in segments])                             # (n_seg, 1, Dp)

    out = pl.pallas_call(
        functools.partial(_fused_ln_matmul_kernel, n_seg),
        out_shape=jax.ShapeDtypeStruct((mp, dout_pad), jnp.float32),
        grid_spec=pl.GridSpec(
            grid=(mp // tm,),
            in_specs=[
                pl.BlockSpec((tm, din), lambda i: (i, 0)),
                pl.BlockSpec((tm, 1), lambda i: (i, 0)),
                pl.BlockSpec((n_seg, din, dout_pad), lambda i: (0, 0, 0)),
                pl.BlockSpec((n_seg, 1, dout_pad), lambda i: (0, 0, 0)),
            ],
            out_specs=pl.BlockSpec((tm, dout_pad), lambda i: (i, 0)),
        ),
        compiler_params=pltpu.CompilerParams(
            dimension_semantics=("parallel",)),
    )(x_all, seg_ids, w_stack, b_stack)

    results = []
    off = 0
    for m, d in zip(sizes, douts):
        results.append(out[off:off + m, :d])
        off += m
    return results


def fused_ln_linear_groups(segments, *, tm=128):
    """Group segments by Din: one pallas_call per distinct Din (1 at demo dims)."""
    outs = [None] * len(segments)
    by_din = {}
    for i, s in enumerate(segments):
        by_din.setdefault(int(s["x"].shape[-1]), []).append(i)
    for idxs in by_din.values():
        group_outs = fused_ln_linear([segments[i] for i in idxs], tm=tm)
        for i, o in zip(idxs, group_outs):
            outs[i] = o
    return outs


# ---------------------------------------------------------------------------
# Parameter construction (deterministic, synthetic)
# ---------------------------------------------------------------------------
def sinusoid_encoding_table(n_position, d_hid):
    pos = jnp.arange(n_position, dtype=jnp.float32)[:, None]        # (P, 1)
    i = jnp.arange(d_hid, dtype=jnp.float32)[None, :]                # (1, D)
    angle = pos / jnp.power(10000.0, 2.0 * jnp.floor(i / 2.0) / d_hid)
    even = jnp.sin(angle)
    odd = jnp.cos(angle)
    tbl = jnp.where((jnp.arange(d_hid) % 2 == 0)[None, :], even, odd)
    return tbl.astype(jnp.float32)                                   # (P, D)


def make_mlp_params(key, d_in, d_out):
    k_w, k_b = jax.random.split(key)
    gamma = jnp.ones((d_in,), jnp.float32)                # nn.LayerNorm default
    beta = jnp.zeros((d_in,), jnp.float32)
    w = jax.random.normal(k_w, (d_in, d_out), jnp.float32) * 0.02
    b = jax.random.normal(k_b, (d_out,), jnp.float32) * 0.02
    return (gamma, beta, w, b)


def make_projector_params(key, f_obj, f_vis, f_txt, f_out):
    keys = jax.random.split(key, 8)
    params = {
        "obj_mlp1": make_mlp_params(keys[0], f_obj, f_out),
        "obj_mlp2": make_mlp_params(keys[1], f_vis, f_out),
    }
    n_embed = {"whole": 1, "five": 5, "nine": 9}
    for idx, k in enumerate(("whole", "five", "nine")):
        params[f"txt_mlp1_{k}"] = make_mlp_params(keys[2 + 2 * idx], f_txt, f_out)
        params[f"txt_mlp2_{k}"] = make_mlp_params(keys[3 + 2 * idx], f_vis, f_out)
        params[f"txt_pos_{k}"] = sinusoid_encoding_table(n_embed[k], f_out)
    return params


# ---------------------------------------------------------------------------
# Forward pass (assembly in JAX, all LN+Linear in one Pallas kernel)
# ---------------------------------------------------------------------------
# Region position encodings, copied verbatim from the PyTorch reference
# (the 'nine' table intentionally repeats each anchor 3x, as in the original).
_POS_ENCODING = {
    "five": jnp.array([[0.3, 0.3, 0.6, 0.6], [0.7, 0.3, 0.6, 0.6],
                       [0.3, 0.7, 0.6, 0.6], [0.7, 0.7, 0.6, 0.6],
                       [0.5, 0.5, 0.6, 0.6]], jnp.float32),
    "nine": jnp.array([[0.2, 0.2, 0.4, 0.4], [0.2, 0.2, 0.4, 0.4],
                       [0.2, 0.2, 0.4, 0.4], [0.5, 0.5, 0.4, 0.4],
                       [0.5, 0.5, 0.4, 0.4], [0.5, 0.5, 0.4, 0.4],
                       [0.8, 0.8, 0.4, 0.4], [0.8, 0.8, 0.4, 0.4],
                       [0.8, 0.8, 0.4, 0.4]], jnp.float32),
    "whole": jnp.array([[0.5, 0.5, 0.5, 0.5]], jnp.float32),
}


def _fold_ln_into_linear(p):
    """Fold LN affine (gamma, beta) into the following Linear (exact algebra)."""
    gamma, beta, w, b = p
    return gamma[:, None] * w, beta @ w + b


def projector_forward(params, obj, vis_ctx, txt_ctx, f_out):
    B, n_obj, f_obj = obj.shape

    # ----- segment 0: the four f_vis->f_out heads applied to vis_ctx, stacked
    # along the output axis so LN(img) is computed once and output is 4*f_out wide.
    w2, b2 = [], []
    for name in ("obj_mlp2", "txt_mlp2_whole", "txt_mlp2_five", "txt_mlp2_nine"):
        wf, bf = _fold_ln_into_linear(params[name])
        w2.append(wf)
        b2.append(bf)
    segments = [dict(x=vis_ctx,
                     w=jnp.concatenate(w2, axis=1),       # (f_vis, 4*f_out)
                     b=jnp.concatenate(b2, axis=0))]      # (4*f_out,)

    # ----- segment 1: obj_mlp1 rows
    w_o, b_o = _fold_ln_into_linear(params["obj_mlp1"])
    segments.append(dict(x=obj.reshape(B * n_obj, f_obj), w=w_o, b=b_o))

    # ----- segments 2..4: txt_mlp1_{whole,five,nine} rows (embed ++ region posEnc)
    txt_shapes = {}
    for k in ("whole", "five", "nine"):
        pos_k = txt_ctx[k]["pos"]                         # (bt, L) int32
        embed_k = txt_ctx[k]["embed"]                     # (bt, L, f_txt-4)
        posEnc = _POS_ENCODING[k]                         # (n_k, 4)
        bt = pos_k.shape[0]
        posEnc_ = jnp.tile(posEnc[None, :, :], (bt, 1, 12)).reshape(bt, -1, 4)
        ek = jnp.concatenate([embed_k, posEnc_], axis=-1)     # (bt, L, f_txt)
        L, f_txt = ek.shape[1], ek.shape[2]
        wk, bk = _fold_ln_into_linear(params[f"txt_mlp1_{k}"])
        segments.append(dict(x=ek.reshape(bt * L, f_txt), w=wk, b=bk))
        txt_shapes[k] = (bt, L)

    # One fused pallas_call (per distinct Din; exactly one at the demo dims).
    outs = fused_ln_linear_groups(segments)

    img_out = outs[0]                                     # (B, 4*f_out)
    obj2 = img_out[:, 0:f_out]
    y2 = {"whole": img_out[:, f_out:2 * f_out],
          "five": img_out[:, 2 * f_out:3 * f_out],
          "nine": img_out[:, 3 * f_out:4 * f_out]}

    obj1 = outs[1].reshape(B, n_obj, f_out)
    obj_mask = jnp.sum(jnp.abs(obj), axis=-1) == 0        # (B, n_obj)
    obj_embed = jnp.where(obj_mask[..., None], 0.0, obj1 + obj2[:, None, :])

    embed = [obj_embed]
    for idx, k in enumerate(("whole", "five", "nine")):
        bt, L = txt_shapes[k]
        y1 = outs[2 + idx].reshape(bt, L, f_out)
        pos_emb = jnp.take(params[f"txt_pos_{k}"], txt_ctx[k]["pos"], axis=0)
        embed.append(y1 + y2[k][:, None, :] + pos_emb)

    # Dropout layers run in eval mode (identity).
    # TODO(synk): train-mode dropout would need pltpu.prng_* masks; omitted (eval).
    return jnp.concatenate(embed, axis=1)


# ---------------------------------------------------------------------------
# Demo
# ---------------------------------------------------------------------------
if __name__ == "__main__":
    B = 2
    N_OBJ = 8
    F_OBJ, F_VIS, F_TXT, F_OUT = 32, 32, 32, 32

    root = jax.random.PRNGKey(0)
    k_param, k_obj, k_vis, k_w, k_f, k_n = jax.random.split(root, 6)

    params = make_projector_params(k_param, F_OBJ, F_VIS, F_TXT, F_OUT)

    obj = jax.random.normal(k_obj, (B, N_OBJ, F_OBJ), jnp.float32)
    # zero out one object row to exercise obj_mask
    obj = obj.at[0, -1].set(0.0)
    vis_ctx = jax.random.normal(k_vis, (B, F_VIS), jnp.float32)

    def make_txt(key, n_k):
        L = n_k * 12
        pos = jnp.tile(jnp.repeat(jnp.arange(n_k, dtype=jnp.int32), 12)[None, :], (B, 1))
        emb = jax.random.normal(key, (B, L, F_TXT - 4), jnp.float32)
        return {"pos": pos, "embed": emb}

    txt_ctx = {
        "whole": make_txt(k_w, 1),
        "five": make_txt(k_f, 5),
        "nine": make_txt(k_n, 9),
    }

    fwd = jax.jit(lambda p, o, v, t: projector_forward(p, o, v, t, F_OUT))
    out = jax.block_until_ready(fwd(params, obj, vis_ctx, txt_ctx))

    expected_len = N_OBJ + 12 + 60 + 108
    assert out.shape == (B, expected_len, F_OUT), out.shape
    # masked object row must be exactly zero
    assert float(jnp.max(jnp.abs(out[0, N_OBJ - 1]))) == 0.0

    print("KERNEL_OK")
</pallas_src>

<mosaic_0001>
module attributes {stable_mosaic.version = 11 : i64} {
  func.func @_fused_ln_matmul_kernel(%arg0: i32, %arg1: memref<128x32xf32, #tpu.memory_space<vmem>>, %arg2: memref<128x1xi32, #tpu.memory_space<vmem>>, %arg3: memref<5x32x128xf32, #tpu.memory_space<vmem>>, %arg4: memref<5x1x128xf32, #tpu.memory_space<vmem>>, %arg5: memref<128x128xf32, #tpu.memory_space<vmem>>) attributes {dimension_semantics = [#tpu.dimension_semantics<parallel>], iteration_bounds = array<i64: 3>, scalar_prefetch = 0 : i64, scratch_operands = 0 : i64, tpu.core_type = #tpu.core_type<tc>, window_params = [{transform_indices = @transform_0, window_bounds = array<i64: 128, 32>}, {transform_indices = @transform_1, window_bounds = array<i64: 128, 1>}, {pipeline_mode = #tpu.pipeline_mode<synchronous>, transform_indices = @transform_2, window_bounds = array<i64: 5, 32, 128>}, {pipeline_mode = #tpu.pipeline_mode<synchronous>, transform_indices = @transform_3, window_bounds = array<i64: 5, 1, 128>}, {transform_indices = @transform_4, window_bounds = array<i64: 128, 128>}]} {
    %c0 = arith.constant 0 : index
    %c0_0 = arith.constant 0 : index
    %0 = vector.load %arg1[%c0, %c0_0] : memref<128x32xf32, #tpu.memory_space<vmem>>, vector<128x32xf32>
    %cst = arith.constant dense<0.000000e+00> : vector<128xf32>
    %1 = vector.multi_reduction <add>, %0, %cst [1] : vector<128x32xf32> to vector<128xf32>
    %2 = vector.shape_cast %1 : vector<128xf32> to vector<128x1xf32>
    %cst_1 = arith.constant 3.200000e+01 : f32
    %3 = vector.broadcast %cst_1 : f32 to vector<128x1xf32>
    %4 = arith.divf %2, %3 : vector<128x1xf32>
    %5 = vector.broadcast %4 : vector<128x1xf32> to vector<128x32xf32>
    %6 = arith.subf %0, %5 : vector<128x32xf32>
    %7 = arith.mulf %6, %6 : vector<128x32xf32>
    %cst_2 = arith.constant dense<0.000000e+00> : vector<128xf32>
    %8 = vector.multi_reduction <add>, %7, %cst_2 [1] : vector<128x32xf32> to vector<128xf32>
    %9 = vector.shape_cast %8 : vector<128xf32> to vector<128x1xf32>
    %cst_3 = arith.constant 3.200000e+01 : f32
    %10 = vector.broadcast %cst_3 : f32 to vector<128x1xf32>
    %11 = arith.divf %9, %10 : vector<128x1xf32>
    %12 = vector.broadcast %4 : vector<128x1xf32> to vector<128x32xf32>
    %13 = arith.subf %0, %12 : vector<128x32xf32>
    %cst_4 = arith.constant 9.99999974E-6 : f32
    %14 = vector.broadcast %cst_4 : f32 to vector<128x1xf32>
    %15 = arith.addf %11, %14 : vector<128x1xf32>
    %16 = math.rsqrt %15 : vector<128x1xf32>
    %17 = vector.broadcast %16 : vector<128x1xf32> to vector<128x32xf32>
    %18 = arith.mulf %13, %17 : vector<128x32xf32>
    %c0_5 = arith.constant 0 : index
    %c0_6 = arith.constant 0 : index
    %19 = vector.load %arg2[%c0_5, %c0_6] : memref<128x1xi32, #tpu.memory_space<vmem>>, vector<128x1xi32>
    %cst_7 = arith.constant 0.000000e+00 : f32
    %20 = vector.broadcast %cst_7 : f32 to vector<128x128xf32>
    %c0_8 = arith.constant 0 : index
    %c0_9 = arith.constant 0 : index
    %c0_10 = arith.constant 0 : index
    %21 = vector.load %arg3[%c0_8, %c0_9, %c0_10] : memref<5x32x128xf32, #tpu.memory_space<vmem>>, vector<1x32x128xf32>
    %22 = vector.shape_cast %21 : vector<1x32x128xf32> to vector<32x128xf32>
    %cst_11 = arith.constant dense<0.000000e+00> : vector<128x128xf32>
    %23 = tpu.matmul %18, %22, %cst_11 {dimension_numbers = #tpu.dot_dimension_numbers<[1], [0], [0], [1], [0, 0, 1, 1], [], []>} : vector<128x32xf32>, vector<32x128xf32>, vector<128x128xf32> -> vector<128x128xf32>
    %c0_12 = arith.constant 0 : index
    %c0_13 = arith.constant 0 : index
    %c0_14 = arith.constant 0 : index
    %24 = vector.load %arg4[%c0_12, %c0_13, %c0_14] : memref<5x1x128xf32, #tpu.memory_space<vmem>>, vector<1x1x128xf32>
    %25 = vector.shape_cast %24 : vector<1x1x128xf32> to vector<1x128xf32>
    %26 = vector.broadcast %25 : vector<1x128xf32> to vector<128x128xf32>
    %27 = arith.addf %23, %26 : vector<128x128xf32>
    %c0_i32 = arith.constant 0 : i32
    %28 = vector.broadcast %c0_i32 : i32 to vector<128x1xi32>
    %29 = arith.cmpi eq, %19, %28 : vector<128x1xi32>
    %30 = vector.shape_cast %29 : vector<128x1xi1> to vector<128x1xi1>
    %31 = vector.broadcast %30 : vector<128x1xi1> to vector<128x128xi1>
    %32 = arith.select %31, %27, %20 : vector<128x128xi1>, vector<128x128xf32>
    %c1 = arith.constant 1 : index
    %c0_15 = arith.constant 0 : index
    %c0_16 = arith.constant 0 : index
    %33 = vector.load %arg3[%c1, %c0_15, %c0_16] : memref<5x32x128xf32, #tpu.memory_space<vmem>>, vector<1x32x128xf32>
    %34 = vector.shape_cast %33 : vector<1x32x128xf32> to vector<32x128xf32>
    %cst_17 = arith.constant dense<0.000000e+00> : vector<128x128xf32>
    %35 = tpu.matmul %18, %34, %cst_17 {dimension_numbers = #tpu.dot_dimension_numbers<[1], [0], [0], [1], [0, 0, 1, 1], [], []>} : vector<128x32xf32>, vector<32x128xf32>, vector<128x128xf32> -> vector<128x128xf32>
    %c1_18 = arith.constant 1 : index
    %c0_19 = arith.constant 0 : index
    %c0_20 = arith.constant 0 : index
    %36 = vector.load %arg4[%c1_18, %c0_19, %c0_20] : memref<5x1x128xf32, #tpu.memory_space<vmem>>, vector<1x1x128xf32>
    %37 = vector.shape_cast %36 : vector<1x1x128xf32> to vector<1x128xf32>
    %38 = vector.broadcast %37 : vector<1x128xf32> to vector<128x128xf32>
    %39 = arith.addf %35, %38 : vector<128x128xf32>
    %c1_i32 = arith.constant 1 : i32
    %40 = vector.broadcast %c1_i32 : i32 to vector<128x1xi32>
    %41 = arith.cmpi eq, %19, %40 : vector<128x1xi32>
    %42 = vector.shape_cast %41 : vector<128x1xi1> to vector<128x1xi1>
    %43 = vector.broadcast %42 : vector<128x1xi1> to vector<128x128xi1>
    %44 = arith.select %43, %39, %32 : vector<128x128xi1>, vector<128x128xf32>
    %c2 = arith.constant 2 : index
    %c0_21 = arith.constant 0 : index
    %c0_22 = arith.constant 0 : index
    %45 = vector.load %arg3[%c2, %c0_21, %c0_22] : memref<5x32x128xf32, #tpu.memory_space<vmem>>, vector<1x32x128xf32>
    %46 = vector.shape_cast %45 : vector<1x32x128xf32> to vector<32x128xf32>
    %cst_23 = arith.constant dense<0.000000e+00> : vector<128x128xf32>
    %47 = tpu.matmul %18, %46, %cst_23 {dimension_numbers = #tpu.dot_dimension_numbers<[1], [0], [0], [1], [0, 0, 1, 1], [], []>} : vector<128x32xf32>, vector<32x128xf32>, vector<128x128xf32> -> vector<128x128xf32>
    %c2_24 = arith.constant 2 : index
    %c0_25 = arith.constant 0 : index
    %c0_26 = arith.constant 0 : index
    %48 = vector.load %arg4[%c2_24, %c0_25, %c0_26] : memref<5x1x128xf32, #tpu.memory_space<vmem>>, vector<1x1x128xf32>
    %49 = vector.shape_cast %48 : vector<1x1x128xf32> to vector<1x128xf32>
    %50 = vector.broadcast %49 : vector<1x128xf32> to vector<128x128xf32>
    %51 = arith.addf %47, %50 : vector<128x128xf32>
    %c2_i32 = arith.constant 2 : i32
    %52 = vector.broadcast %c2_i32 : i32 to vector<128x1xi32>
    %53 = arith.cmpi eq, %19, %52 : vector<128x1xi32>
    %54 = vector.shape_cast %53 : vector<128x1xi1> to vector<128x1xi1>
    %55 = vector.broadcast %54 : vector<128x1xi1> to vector<128x128xi1>
    %56 = arith.select %55, %51, %44 : vector<128x128xi1>, vector<128x128xf32>
    %c3 = arith.constant 3 : index
    %c0_27 = arith.constant 0 : index
    %c0_28 = arith.constant 0 : index
    %57 = vector.load %arg3[%c3, %c0_27, %c0_28] : memref<5x32x128xf32, #tpu.memory_space<vmem>>, vector<1x32x128xf32>
    %58 = vector.shape_cast %57 : vector<1x32x128xf32> to vector<32x128xf32>
    %cst_29 = arith.constant dense<0.000000e+00> : vector<128x128xf32>
    %59 = tpu.matmul %18, %58, %cst_29 {dimension_numbers = #tpu.dot_dimension_numbers<[1], [0], [0], [1], [0, 0, 1, 1], [], []>} : vector<128x32xf32>, vector<32x128xf32>, vector<128x128xf32> -> vector<128x128xf32>
    %c3_30 = arith.constant 3 : index
    %c0_31 = arith.constant 0 : index
    %c0_32 = arith.constant 0 : index
    %60 = vector.load %arg4[%c3_30, %c0_31, %c0_32] : memref<5x1x128xf32, #tpu.memory_space<vmem>>, vector<1x1x128xf32>
    %61 = vector.shape_cast %60 : vector<1x1x128xf32> to vector<1x128xf32>
    %62 = vector.broadcast %61 : vector<1x128xf32> to vector<128x128xf32>
    %63 = arith.addf %59, %62 : vector<128x128xf32>
    %c3_i32 = arith.constant 3 : i32
    %64 = vector.broadcast %c3_i32 : i32 to vector<128x1xi32>
    %65 = arith.cmpi eq, %19, %64 : vector<128x1xi32>
    %66 = vector.shape_cast %65 : vector<128x1xi1> to vector<128x1xi1>
    %67 = vector.broadcast %66 : vector<128x1xi1> to vector<128x128xi1>
    %68 = arith.select %67, %63, %56 : vector<128x128xi1>, vector<128x128xf32>
    %c4 = arith.constant 4 : index
    %c0_33 = arith.constant 0 : index
    %c0_34 = arith.constant 0 : index
    %69 = vector.load %arg3[%c4, %c0_33, %c0_34] : memref<5x32x128xf32, #tpu.memory_space<vmem>>, vector<1x32x128xf32>
    %70 = vector.shape_cast %69 : vector<1x32x128xf32> to vector<32x128xf32>
    %cst_35 = arith.constant dense<0.000000e+00> : vector<128x128xf32>
    %71 = tpu.matmul %18, %70, %cst_35 {dimension_numbers = #tpu.dot_dimension_numbers<[1], [0], [0], [1], [0, 0, 1, 1], [], []>} : vector<128x32xf32>, vector<32x128xf32>, vector<128x128xf32> -> vector<128x128xf32>
    %c4_36 = arith.constant 4 : index
    %c0_37 = arith.constant 0 : index
    %c0_38 = arith.constant 0 : index
    %72 = vector.load %arg4[%c4_36, %c0_37, %c0_38] : memref<5x1x128xf32, #tpu.memory_space<vmem>>, vector<1x1x128xf32>
    %73 = vector.shape_cast %72 : vector<1x1x128xf32> to vector<1x128xf32>
    %74 = vector.broadcast %73 : vector<1x128xf32> to vector<128x128xf32>
    %75 = arith.addf %71, %74 : vector<128x128xf32>
    %c4_i32 = arith.constant 4 : i32
    %76 = vector.broadcast %c4_i32 : i32 to vector<128x1xi32>
    %77 = arith.cmpi eq, %19, %76 : vector<128x1xi32>
    %78 = vector.shape_cast %77 : vector<128x1xi1> to vector<128x1xi1>
    %79 = vector.broadcast %78 : vector<128x1xi1> to vector<128x128xi1>
    %80 = arith.select %79, %75, %68 : vector<128x128xi1>, vector<128x128xf32>
    %c0_39 = arith.constant 0 : index
    %c0_40 = arith.constant 0 : index
    %81 = vector.load %arg5[%c0_39, %c0_40] : memref<128x128xf32, #tpu.memory_space<vmem>>, vector<128x128xf32>
    tpu.vector_store %arg5[%c0_39, %c0_40], %80 {strides = array<i32>} : memref<128x128xf32, #tpu.memory_space<vmem>>, vector<128x128xf32>,
    return
  }
  func.func @transform_0(%arg0: i32) -> (i32, i32) {
    %c0_i32 = arith.constant 0 : i32
    %c0_i32_0 = arith.constant 0 : i32
    return %arg0, %c0_i32 : i32, i32
  }
  func.func @transform_1(%arg0: i32) -> (i32, i32) {
    %c0_i32 = arith.constant 0 : i32
    %c0_i32_0 = arith.constant 0 : i32
    return %arg0, %c0_i32 : i32, i32
  }
  func.func @transform_2(%arg0: i32) -> (i32, i32, i32) {
    %c0_i32 = arith.constant 0 : i32
    %c0_i32_0 = arith.constant 0 : i32
    %c0_i32_1 = arith.constant 0 : i32
    %c0_i32_2 = arith.constant 0 : i32
    return %c0_i32, %c0_i32_0, %c0_i32_1 : i32, i32, i32
  }
  func.func @transform_3(%arg0: i32) -> (i32, i32, i32) {
    %c0_i32 = arith.constant 0 : i32
    %c0_i32_0 = arith.constant 0 : i32
    %c0_i32_1 = arith.constant 0 : i32
    %c0_i32_2 = arith.constant 0 : i32
    return %c0_i32, %c0_i32_0, %c0_i32_1 : i32, i32, i32
  }
  func.func @transform_4(%arg0: i32) -> (i32, i32) {
    %c0_i32 = arith.constant 0 : i32
    %c0_i32_0 = arith.constant 0 : i32
    return %arg0, %c0_i32 : i32, i32
  }
}

</mosaic_0001>

<bundles_post_ra>
// kernel: _lambda_.1
= control target key start
LH: loop header
LB: loop body
LE: loop exit
PB: predicated region body
PF: predicated region fallthrough
CT: control target
= control target key end

     0   :  { %s2408_s15 = smov 0   ;;  %s3592_s0 = inlined_call_operand.vmem [shape: f32[384,32], index: 0, kind: input, shape index: {}]   ;;  %s3593_s1 = inlined_call_operand.vmem [shape: s32[384,1], index: 1, kind: input, shape index: {}]   ;;  %s3594_s2 = inlined_call_operand.vmem [shape: f32[5,32,128], index: 2, kind: input, shape index: {}]   ;;  %s3595_s3 = inlined_call_operand.vmem [shape: f32[5,1,128], index: 3, kind: input, shape index: {}]   ;;  %s3596_s4 = inlined_call_operand.vmem [shape: f32[384,128], index: 4, kind: output, shape index: {}]  }
   0x1 LB: > { %s1945_s16 = sadd.s32 4294967295, %s2380_s15   ;;  %p1949_p0 = scmp.ge.s32.totalorder %s2380_s15, 1  ;;  %s2380_s15 = sphi %s2408_s15, %s14_s15  }
   0x2   : > { %p174_p1 = scmp.lt.s32.totalorder %s2380_s15, 4 }
   0x4   : > { %p175_p2 = pnand %p1949_p0, %p174_p1 }
   0x6   : > { %178 = sbr.rel (%p175_p2) target bundleno = 619 (0x26b), region = 36 }
   0xb   : > { %s1950_s17 = sshll.u32 %s1945_s16, 4  ;;  %vm239_vm0 = vcmask 261120   ;;  %v2382_v32 = vmov 0  }
   0xc   : > { %p206_p3 = scmp.lt.s32.totalorder %s1950_s17, 47  ;;  %2341 = vset.pattern.permute.xlu1 %v2382_v32  ;;  %2340 = vset.pattern.permute.xlu0 %v2382_v32 }
   0xe   : > { %s3664_s17 = smov (!%p206_p3, %s1950_s17), 47 }
   0xf   : > { %s2416_s18 = sshll.u32 %s3664_s17, 3 }
  0x10   : > { %s2422_s21 = scalar_lea.vmem %s3592_s0, %s2416_s18  ;;  %s2598_s6 = scalar_lea.vmem %s3593_s1, %s2416_s18 }
  0x11   : > { %v232_v0 = vld [vmem:[%s2422_s21 + $0x48] sm:$0xff]  ;;  %v231_v1 = vld [vmem:[%s2422_s21 + $0x40] sm:$0xff]  ;;  %v225_v8 = vld [vmem:[%s2422_s21 + $0x10] sm:$0xff]  ;;  %s3414_s29 = scalar_lea.vmem %s3596_s4, %s2416_s18 }
  0x12   : > { %v224_v2 = vld [vmem:[%s2422_s21 + $0x8] sm:$0xff]  ;;  %v267_v3 = vsel %vm239_vm0, %v232_v0, 0.0  ;;  %v264_v4 = vsel %vm239_vm0, %v231_v1, 0.0  ;;  %v223_v5 = vld [vmem:[%s2422_s21] sm:$0xff]  ;;  %v2434_v9 = vld [vmem:[%s2422_s21 + $0x50] sm:$0xff]  ;;  %v246_v10 = vsel %vm239_vm0, %v225_v8, 0.0 }
  0x13   : > { %268 = vadd.xlane.f32.xlu1 %v267_v3  ;;  %265 = vadd.xlane.f32.xlu0 %v264_v4  ;;  %v243_v6 = vsel %vm239_vm0, %v224_v2, 0.0  ;;  %v240_v7 = vsel %vm239_vm0, %v223_v5, 0.0  ;;  %v270_v11 = vsel %vm239_vm0, %v2434_v9, 0.0  ;;  %v2440_v12 = vld [vmem:[%s2422_s21 + $0x18] sm:$0xff]  ;;  %v2450_v16 = vld [vmem:[%s2422_s21 + $0x20] sm:$0xff]  ;;  %v2460_v20 = vld [vmem:[%s2422_s21 + $0x28] sm:$0xff] }
  0x14   : > { %v2443_v13 = vld [vmem:[%s2422_s21 + $0x58] sm:$0xff]  ;;  %v249_v14 = vsel %vm239_vm0, %v2440_v12, 0.0  ;;  %v2453_v17 = vld [vmem:[%s2422_s21 + $0x60] sm:$0xff]  ;;  %v252_v18 = vsel %vm239_vm0, %v2450_v16, 0.0  ;;  %v2463_v21 = vld [vmem:[%s2422_s21 + $0x68] sm:$0xff]  ;;  %v255_v22 = vsel %vm239_vm0, %v2460_v20, 0.0 }
  0x15   : > { %v273_v15 = vsel %vm239_vm0, %v2443_v13, 0.0  ;;  %v276_v19 = vsel %vm239_vm0, %v2453_v17, 0.0  ;;  %v279_v23 = vsel %vm239_vm0, %v2463_v21, 0.0  ;;  %v2470_v24 = vld [vmem:[%s2422_s21 + $0x30] sm:$0xff]  ;;  %v2480_v28 = vld [vmem:[%s2422_s21 + $0x38] sm:$0xff] }
  0x16   : > { %v2473_v25 = vld [vmem:[%s2422_s21 + $0x70] sm:$0xff]  ;;  %v258_v26 = vsel %vm239_vm0, %v2470_v24, 0.0  ;;  %v2483_v29 = vld [vmem:[%s2422_s21 + $0x78] sm:$0xff]  ;;  %v261_v30 = vsel %vm239_vm0, %v2480_v28, 0.0 }
  0x17   : > { %244 = vadd.xlane.f32.xlu1 %v243_v6  ;;  %241 = vadd.xlane.f32.xlu0 %v240_v7  ;;  %v282_v27 = vsel %vm239_vm0, %v2473_v25, 0.0  ;;  %v285_v31 = vsel %vm239_vm0, %v2483_v29, 0.0 }
  0x1b   : > { %247 = vadd.xlane.f32.xlu1 %v246_v10  ;;  %271 = vadd.xlane.f32.xlu0 %v270_v11 }
  0x1f   : > { %250 = vadd.xlane.f32.xlu1 %v249_v14  ;;  %274 = vadd.xlane.f32.xlu0 %v273_v15 }
  0x23   : > { %253 = vadd.xlane.f32.xlu1 %v252_v18  ;;  %277 = vadd.xlane.f32.xlu0 %v276_v19 }
  0x27   : > { %256 = vadd.xlane.f32.xlu1 %v255_v22  ;;  %280 = vadd.xlane.f32.xlu0 %v279_v23 }
  0x2b   : > { %259 = vadd.xlane.f32.xlu1 %v258_v26  ;;  %283 = vadd.xlane.f32.xlu0 %v282_v27 }
  0x2f   : > { %262 = vadd.xlane.f32.xlu1 %v261_v30  ;;  %286 = vadd.xlane.f32.xlu0 %v285_v31 }
  0x9c   : > { %v269_v33 = vpop.xlane.xlu1 %268  ;;  %v266_v34 = vpop.xlane.xlu0 %265 }
  0x9d   : > { %v298_v35 = vmul.f32 0.03125, %v269_v33  ;;  %v297_v36 = vmul.f32 0.03125, %v266_v34 }
  0x9f   : > { %v2491_v41 = vsub.f32 %v232_v0, %v298_v35  ;;  %v2493_v42 = vsub.f32 %v231_v1, %v297_v36 }
  0xa0   : > { %v245_v37 = vpop.xlane.xlu1 %244  ;;  %v242_v38 = vpop.xlane.xlu0 %241 }
  0xa1   : > { %v290_v39 = vmul.f32 0.03125, %v245_v37  ;;  %v289_v40 = vmul.f32 0.03125, %v242_v38  ;;  %v330_v51 = vmul.f32 %v2491_v41, %v2491_v41  ;;  %v329_v52 = vmul.f32 %v2493_v42, %v2493_v42 }
  0xa3   : > { %v2495_v43 = vsub.f32 %v224_v2, %v290_v39  ;;  %v2497_v44 = vsub.f32 %v223_v5, %v289_v40  ;;  %v364_v63 = vsel %vm239_vm0, %v330_v51, 0.0  ;;  %v361_v1 = vsel %vm239_vm0, %v329_v52, 0.0 }
  0xa4   : > { %v248_v45 = vpop.xlane.xlu1 %247  ;;  %v272_v46 = vpop.xlane.xlu0 %271 }
  0xa5   : > { %v322_v47 = vmul.f32 %v2495_v43, %v2495_v43  ;;  %v291_v48 = vmul.f32 0.03125, %v248_v45  ;;  %v321_v49 = vmul.f32 %v2497_v44, %v2497_v44  ;;  %v299_v50 = vmul.f32 0.03125, %v272_v46 }
  0xa7   : > { %v340_v53 = vsel %vm239_vm0, %v322_v47, 0.0  ;;  %v2508_v54 = vsub.f32 %v225_v8, %v291_v48  ;;  %v337_v55 = vsel %vm239_vm0, %v321_v49, 0.0  ;;  %v2512_v56 = vsub.f32 %v2434_v9, %v299_v50 }
  0xa8   : > { %341 = vadd.xlane.f32.xlu1 %v340_v53  ;;  %338 = vadd.xlane.f32.xlu0 %v337_v55  ;;  %v251_v57 = vpop.xlane.xlu1 %250  ;;  %v275_v58 = vpop.xlane.xlu0 %274 }
  0xa9   : > { %v292_v59 = vmul.f32 0.03125, %v251_v57  ;;  %v300_v60 = vmul.f32 0.03125, %v275_v58  ;;  %v323_v61 = vmul.f32 %v2508_v54, %v2508_v54  ;;  %v331_v62 = vmul.f32 %v2512_v56, %v2512_v56  ;;  %v467_v57 = vld [vmem:[%s3594_s2 + $0x10] sm:$0xff]  ;;  %v466_v58 = vld [vmem:[%s3594_s2 + $0x8] sm:$0xff] }
  0xab   : > { %v2520_v0 = vsub.f32 %v2440_v12, %v292_v59  ;;  %v2524_v2 = vsub.f32 %v2443_v13, %v300_v60  ;;  %v343_v3 = vsel %vm239_vm0, %v323_v61, 0.0  ;;  %v367_v5 = vsel %vm239_vm0, %v331_v62, 0.0  ;;  %v465_v59 = vld [vmem:[%s3594_s2] sm:$0xff]  ;;  %v2601_v60 = vld [vmem:[%s2598_s6 + $0x8] sm:$0xff]  ;;  %v2605_v61 = vld [vmem:[%s2598_s6 + $0x10] sm:$0xff] }
  0xac   : > { %365 = vadd.xlane.f32.xlu1 %v364_v63  ;;  %362 = vadd.xlane.f32.xlu0 %v361_v1  ;;  %v254_v4 = vpop.xlane.xlu1 %253  ;;  %v278_v6 = vpop.xlane.xlu0 %277  ;;  %vm670_vm1 = vcmp.eq.s32.totalorder %v2601_v60, 0  ;;  %v2608_v62 = vld [vmem:[%s2598_s6] sm:$0xff]  ;;  %vm671_vm2 = vcmp.eq.s32.totalorder %v2605_v61, 0  ;;  %v2615_v1 = vld [vmem:[%s3594_s2 + $0x38] sm:$0xff]  ;;  %vm940_vm13 = vcmp.eq.s32.totalorder %v2601_v60, 1 }
  0xad   : > { %v293_v7 = vmul.f32 0.03125, %v254_v4  ;;  %v301_v8 = vmul.f32 0.03125, %v278_v6  ;;  %v324_v9 = vmul.f32 %v2520_v0, %v2520_v0  ;;  %v332_v10 = vmul.f32 %v2524_v2, %v2524_v2  ;;  %v2623_v4 = vld [vmem:[%s2598_s6 + $0x48] sm:$0xff]  ;;  %v2629_v6 = vld [vmem:[%s3594_s2 + $0x58] sm:$0xff] }
  0xae   : > { %v686_v63 = vsel %vm670_vm1, 1, %v2382_v32  ;;  %vm669_vm3 = vcmp.eq.s32.totalorder %v2608_v62, 0  ;;  %vm678_vm5 = vcmp.eq.s32.totalorder %v2623_v4, 0 }
  0xaf   : > { %v2533_v11 = vsub.f32 %v2450_v16, %v293_v7  ;;  %v2536_v12 = vsub.f32 %v2453_v17, %v301_v8  ;;  %v346_v13 = vsel %vm239_vm0, %v324_v9, 0.0  ;;  %v370_v15 = vsel %vm239_vm0, %v332_v10, 0.0  ;;  %v2636_v8 = vld [vmem:[%s2598_s6 + $0x20] sm:$0xff]  ;;  %v2639_v9 = vld [vmem:[%s2598_s6 + $0x58] sm:$0xff] }
  0xb0   : > { %344 = vadd.xlane.f32.xlu1 %v343_v3  ;;  %368 = vadd.xlane.f32.xlu0 %v367_v5  ;;  %v257_v14 = vpop.xlane.xlu1 %256  ;;  %v281_v18 = vpop.xlane.xlu0 %280  ;;  %v2619_v3 = vld [vmem:[%s2598_s6 + $0x18] sm:$0xff]  ;;  %v687_v5 = vsel %vm671_vm2, 1, %v2382_v32  ;;  %v685_v7 = vsel %vm669_vm3, 1, %v2382_v32  ;;  %vm673_vm6 = vcmp.eq.s32.totalorder %v2636_v8, 0  ;;  %vm680_vm7 = vcmp.eq.s32.totalorder %v2639_v9, 0 }
  0xb1   : > { %v294_v19 = vmul.f32 0.03125, %v257_v14  ;;  %v302_v22 = vmul.f32 0.03125, %v281_v18  ;;  %v325_v23 = vmul.f32 %v2533_v11, %v2533_v11  ;;  %v333_v16 = vmul.f32 %v2536_v12, %v2536_v12  ;;  %v2646_v14 = vld [vmem:[%s2598_s6 + $0x28] sm:$0xff] }
  0xb2   : > { %vm672_vm4 = vcmp.eq.s32.totalorder %v2619_v3, 0  ;;  %v689_v18 = vsel %vm673_vm6, 1, %v2382_v32  ;;  %vm674_vm8 = vcmp.eq.s32.totalorder %v2646_v14, 0  ;;  %vm942_vm15 = vcmp.eq.s32.totalorder %v2619_v3, 1 }
  0xb3   : > { %v2545_v26 = vsub.f32 %v2460_v20, %v294_v19  ;;  %v2548_v17 = vsub.f32 %v2463_v21, %v302_v22  ;;  %v349_v27 = vsel %vm239_vm0, %v325_v23, 0.0  ;;  %v373_v31 = vsel %vm239_vm0, %v333_v16, 0.0  ;;  %v2656_v22 = vld [vmem:[%s2598_s6 + $0x30] sm:$0xff]  ;;  %v2659_v23 = vld [vmem:[%s2598_s6 + $0x78] sm:$0xff] }
  0xb4   : > { %347 = vadd.xlane.f32.xlu1 %v346_v13  ;;  %371 = vadd.xlane.f32.xlu0 %v370_v15  ;;  %v260_v30 = vpop.xlane.xlu1 %259  ;;  %v284_v33 = vpop.xlane.xlu0 %283  ;;  %v688_v10 = vsel %vm672_vm4, 1, %v2382_v32  ;;  %v694_v13 = vsel %vm678_vm5, 1, %v2382_v32  ;;  %v2649_v15 = vld [vmem:[%s2598_s6 + $0x68] sm:$0xff]  ;;  %v696_v19 = vsel %vm680_vm7, 1, %v2382_v32  ;;  %v690_v16 = vsel %vm674_vm8, 1, %v2382_v32 }
  0xb5   : > { %v295_v34 = vmul.f32 0.03125, %v260_v30  ;;  %v303_v35 = vmul.f32 0.03125, %v284_v33  ;;  %v326_v36 = vmul.f32 %v2545_v26, %v2545_v26  ;;  %v334_v20 = vmul.f32 %v2548_v17, %v2548_v17  ;;  %v2666_v30 = vld [vmem:[%s2598_s6 + $0x38] sm:$0xff] }
  0xb6   : > { %vm682_vm9 = vcmp.eq.s32.totalorder %v2649_v15, 0  ;;  %vm675_vm10 = vcmp.eq.s32.totalorder %v2656_v22, 0  ;;  %vm684_vm11 = vcmp.eq.s32.totalorder %v2659_v23, 0  ;;  %vm676_vm12 = vcmp.eq.s32.totalorder %v2666_v30, 0 }
  0xb7   : > { %v2557_v37 = vsub.f32 %v2470_v24, %v295_v34  ;;  %v2560_v21 = vsub.f32 %v2473_v25, %v303_v35  ;;  %v352_v38 = vsel %vm239_vm0, %v326_v36, 0.0  ;;  %v376_v40 = vsel %vm239_vm0, %v334_v20, 0.0  ;;  %v2673_v34 = vld [vmem:[%s2598_s6 + $0x40] sm:$0xff]  ;;  %v2680_v20 = vld [vmem:[%s2598_s6 + $0x50] sm:$0xff] }
  0xb8   : > { %350 = vadd.xlane.f32.xlu1 %v349_v27  ;;  %374 = vadd.xlane.f32.xlu0 %v373_v31  ;;  %v263_v39 = vpop.xlane.xlu1 %262  ;;  %v287_v45 = vpop.xlane.xlu0 %286  ;;  %v698_v27 = vsel %vm682_vm9, 1, %v2382_v32  ;;  %v691_v31 = vsel %vm675_vm10, 1, %v2382_v32  ;;  %v700_v33 = vsel %vm684_vm11, 1, %v2382_v32  ;;  %v692_v35 = vsel %vm676_vm12, 1, %v2382_v32 }
  0xb9   : > { %v296_v46 = vmul.f32 0.03125, %v263_v39  ;;  %v304_v47 = vmul.f32 0.03125, %v287_v45  ;;  %v327_v48 = vmul.f32 %v2557_v37, %v2557_v37  ;;  %v335_v24 = vmul.f32 %v2560_v21, %v2560_v21 }
  0xba   : > { %v956_v36 = vsel %vm940_vm13, 1, %v2382_v32  ;;  %vm677_vm14 = vcmp.eq.s32.totalorder %v2673_v34, 0  ;;  %v958_v39 = vsel %vm942_vm15, 1, %v2382_v32  ;;  %vm679_vm1 = vcmp.eq.s32.totalorder %v2680_v20, 0 }
  0xbb   : > { %v2569_v49 = vsub.f32 %v2480_v28, %v296_v46  ;;  %v2572_v25 = vsub.f32 %v2483_v29, %v304_v47  ;;  %v355_v50 = vsel %vm239_vm0, %v327_v48, 0.0  ;;  %v379_v51 = vsel %vm239_vm0, %v335_v24, 0.0  ;;  %v468_v28 = vld [vmem:[%s3594_s2 + $0x18] sm:$0xff]  ;;  %v2694_v47 = vld [vmem:[%s2598_s6 + $0x70] sm:$0xff] }
  0xbc   : > { %353 = vadd.xlane.f32.xlu1 %v352_v38  ;;  %377 = vadd.xlane.f32.xlu0 %v376_v40  ;;  %v693_v38 = vsel %vm677_vm14, 1, %v2382_v32  ;;  %vm944_vm2 = vcmp.eq.s32.totalorder %v2646_v14, 1  ;;  %v2687_v40 = vld [vmem:[%s2598_s6 + $0x60] sm:$0xff]  ;;  %v695_v45 = vsel %vm679_vm1, 1, %v2382_v32  ;;  %vm946_vm4 = vcmp.eq.s32.totalorder %v2666_v30, 1 }
  0xbd   : > { %v328_v52 = vmul.f32 %v2569_v49, %v2569_v49  ;;  %v336_v53 = vmul.f32 %v2572_v25, %v2572_v25  ;;  %2163 = vmatprep.subr.mxu0 %v468_v28  ;;  %2323 = vmatprep.subr.mxu1 %v468_v28  ;;  %v960_v46 = vsel %vm944_vm2, 1, %v2382_v32  ;;  %vm681_vm3 = vcmp.eq.s32.totalorder %v2687_v40, 0 }
  0xbe   : > { %2164 = vmatpush3.msra.mxu0 %v468_v28  ;;  %2327 = vmatpush3.msra.mxu1 %v468_v28  ;;  %v697_v48 = vsel %vm681_vm3, 1, %v2382_v32  ;;  %v962_v24 = vsel %vm946_vm4, 1, %v2382_v32  ;;  %vm683_vm5 = vcmp.eq.s32.totalorder %v2694_v47, 0  ;;  %vm948_vm6 = vcmp.eq.s32.totalorder %v2623_v4, 1 }
  0xbf   : > { %v358_v29 = vsel %vm239_vm0, %v328_v52, 0.0  ;;  %v382_v55 = vsel %vm239_vm0, %v336_v53, 0.0  ;;  %2165 = vmatprep.subr.mxu0 %v467_v57  ;;  %2324 = vmatprep.subr.mxu1 %v467_v57  ;;  %vm939_vm7 = vcmp.eq.s32.totalorder %v2608_v62, 1  ;;  %vm950_vm8 = vcmp.eq.s32.totalorder %v2639_v9, 1 }
  0xc0   : > { %356 = vadd.xlane.f32.xlu1 %v355_v50  ;;  %380 = vadd.xlane.f32.xlu0 %v379_v51  ;;  %v699_v50 = vsel %vm683_vm5, 1, %v2382_v32  ;;  %v964_v51 = vsel %vm948_vm6, 1, %v2382_v32  ;;  %v955_v52 = vsel %vm939_vm7, 1, %v2382_v32  ;;  %v966_v53 = vsel %vm950_vm8, 1, %v2382_v32 }
  0xc1   : > { %2166 = vmatpush3.msra.mxu0 %v467_v57  ;;  %2328 = vmatpush3.msra.mxu1 %v467_v57  ;;  %vm941_vm9 = vcmp.eq.s32.totalorder %v2605_v61, 1  ;;  %vm952_vm10 = vcmp.eq.s32.totalorder %v2649_v15, 1  ;;  %vm943_vm11 = vcmp.eq.s32.totalorder %v2636_v8, 1  ;;  %vm954_vm12 = vcmp.eq.s32.totalorder %v2659_v23, 1 }
  0xc2   : > { %2167 = vmatprep.subr.mxu0 %v466_v58  ;;  %2325 = vmatprep.subr.mxu1 %v466_v58  ;;  %v957_v28 = vsel %vm941_vm9, 1, %v2382_v32  ;;  %v970_v57 = vsel %vm954_vm12, 1, %v2382_v32  ;;  %vm945_vm13 = vcmp.eq.s32.totalorder %v2656_v22, 1  ;;  %vm1210_vm14 = vcmp.eq.s32.totalorder %v2601_v60, 2 }
  0xc3   : > { %2168 = vmatpush3.msra.mxu0 %v466_v58  ;;  %2329 = vmatpush3.msra.mxu1 %v466_v58  ;;  %v961_v58 = vsel %vm945_vm13, 1, %v2382_v32  ;;  %vm947_vm15 = vcmp.eq.s32.totalorder %v2673_v34, 1  ;;  %vm1212_vm1 = vcmp.eq.s32.totalorder %v2619_v3, 2  ;;  %vm949_vm2 = vcmp.eq.s32.totalorder %v2680_v20, 1 }
  0xc4   : > { %359 = vadd.xlane.f32.xlu1 %v358_v29  ;;  %383 = vadd.xlane.f32.xlu0 %v382_v55  ;;  %v968_v29 = vsel %vm952_vm10, 1, %v2382_v32  ;;  %v959_v55 = vsel %vm943_vm11, 1, %v2382_v32  ;;  %vm1214_vm3 = vcmp.eq.s32.totalorder %v2646_v14, 2  ;;  %vm951_vm4 = vcmp.eq.s32.totalorder %v2687_v40, 1 }
  0xc5   : > { %2169 = vmatprep.subr.mxu0 %v465_v59  ;;  %2326 = vmatprep.subr.mxu1 %v465_v59  ;;  %vm1216_vm5 = vcmp.eq.s32.totalorder %v2666_v30, 2  ;;  %vm953_vm6 = vcmp.eq.s32.totalorder %v2694_v47, 1  ;;  %vm1218_vm7 = vcmp.eq.s32.totalorder %v2623_v4, 2  ;;  %vm1209_vm8 = vcmp.eq.s32.totalorder %v2608_v62, 2 }
  0xc6   : > { %2170 = vmatpush3.msra.mxu0 %v465_v59  ;;  %2330 = vmatpush3.msra.mxu1 %v465_v59  ;;  %v1226_v59 = vsel %vm1210_vm14, 1, %v2382_v32  ;;  %vm1220_vm9 = vcmp.eq.s32.totalorder %v2639_v9, 2  ;;  %vm1211_vm10 = vcmp.eq.s32.totalorder %v2605_v61, 2  ;;  %vm1222_vm11 = vcmp.eq.s32.totalorder %v2649_v15, 2 }
  0xc7   : > { %2195 = vmatprep.subr.mxu1 %v2615_v1  ;;  %2227 = vmatprep.subr.mxu0 %v2629_v6  ;;  %vm1213_vm12 = vcmp.eq.s32.totalorder %v2636_v8, 2  ;;  %vm1224_vm13 = vcmp.eq.s32.totalorder %v2659_v23, 2  ;;  %vm1215_vm14 = vcmp.eq.s32.totalorder %v2656_v22, 2 }
  0xd5   : > { %705 = vperm.xlu1 %2341, %v686_v63   ;;  %v963_v63 = vsel %vm947_vm15, 1, %v2382_v32  ;;  %vm1480_vm15 = vcmp.eq.s32.totalorder %v2601_v60, 3 }
  0xd9   : > { %708 = vperm.xlu1 %2341, %v687_v5   ;;  %v1228_v5 = vsel %vm1212_vm1, 1, %v2382_v32  ;;  %vm1217_vm1 = vcmp.eq.s32.totalorder %v2673_v34, 2 }
  0xda   : > { %702 = vperm.xlu0 %2340, %v685_v7   ;;  %v965_v7 = vsel %vm949_vm2, 1, %v2382_v32  ;;  %vm1482_vm2 = vcmp.eq.s32.totalorder %v2619_v3, 3 }
  0xdd   : > { %711 = vperm.xlu1 %2341, %v688_v10   ;;  %v1230_v10 = vsel %vm1214_vm3, 1, %v2382_v32  ;;  %vm1219_vm3 = vcmp.eq.s32.totalorder %v2680_v20, 2 }
  0xde   : > { %729 = vperm.xlu0 %2340, %v694_v13   ;;  %v967_v13 = vsel %vm951_vm4, 1, %v2382_v32  ;;  %vm1484_vm4 = vcmp.eq.s32.totalorder %v2646_v14, 3 }
  0xe1   : > { %714 = vperm.xlu1 %2341, %v689_v18   ;;  %v1232_v18 = vsel %vm1216_vm5, 1, %v2382_v32  ;;  %vm1221_vm5 = vcmp.eq.s32.totalorder %v2687_v40, 2 }
  0xe2   : > { %735 = vperm.xlu0 %2340, %v696_v19   ;;  %v969_v19 = vsel %vm953_vm6, 1, %v2382_v32  ;;  %vm1486_vm6 = vcmp.eq.s32.totalorder %v2666_v30, 3 }
  0xe5   : > { %717 = vperm.xlu1 %2341, %v690_v16   ;;  %v1234_v16 = vsel %vm1218_vm7, 1, %v2382_v32  ;;  %vm1223_vm7 = vcmp.eq.s32.totalorder %v2694_v47, 2 }
  0xe6   : > { %741 = vperm.xlu0 %2340, %v698_v27   ;;  %v1225_v27 = vsel %vm1209_vm8, 1, %v2382_v32  ;;  %vm1488_vm8 = vcmp.eq.s32.totalorder %v2623_v4, 3 }
  0xe9   : > { %720 = vperm.xlu1 %2341, %v691_v31   ;;  %v1236_v31 = vsel %vm1220_vm9, 1, %v2382_v32  ;;  %vm1479_vm9 = vcmp.eq.s32.totalorder %v2608_v62, 3 }
  0xea   : > { %747 = vperm.xlu0 %2340, %v700_v33   ;;  %v1227_v33 = vsel %vm1211_vm10, 1, %v2382_v32  ;;  %vm1490_vm10 = vcmp.eq.s32.totalorder %v2639_v9, 3 }
  0xed   : > { %723 = vperm.xlu1 %2341, %v692_v35   ;;  %v1238_v35 = vsel %vm1222_vm11, 1, %v2382_v32  ;;  %vm1481_vm11 = vcmp.eq.s32.totalorder %v2605_v61, 3 }
  0xee   : > { %975 = vperm.xlu0 %2340, %v956_v36   ;;  %v1229_v36 = vsel %vm1213_vm12, 1, %v2382_v32  ;;  %vm1492_vm12 = vcmp.eq.s32.totalorder %v2649_v15, 3 }
  0xf1   : > { %726 = vperm.xlu1 %2341, %v693_v38   ;;  %v1240_v38 = vsel %vm1224_vm13, 1, %v2382_v32  ;;  %vm1483_vm13 = vcmp.eq.s32.totalorder %v2636_v8, 3 }
  0xf2   : > { %981 = vperm.xlu0 %2340, %v958_v39   ;;  %v1231_v39 = vsel %vm1215_vm14, 1, %v2382_v32  ;;  %vm1494_vm14 = vcmp.eq.s32.totalorder %v2659_v23, 3 }
  0xf5   : > { %732 = vperm.xlu1 %2341, %v695_v45   ;;  %v1496_v45 = vsel %vm1480_vm15, 1, %v2382_v32  ;;  %vm1485_vm15 = vcmp.eq.s32.totalorder %v2656_v22, 3 }
  0xf6   : > { %987 = vperm.xlu0 %2340, %v960_v46   ;;  %v1233_v46 = vsel %vm1217_vm1, 1, %v2382_v32  ;;  %vm1750_vm1 = vcmp.eq.s32.totalorder %v2601_v60, 4 }
  0xf9   : > { %738 = vperm.xlu1 %2341, %v697_v48   ;;  %v1498_v48 = vsel %vm1482_vm2, 1, %v2382_v32  ;;  %vm1487_vm2 = vcmp.eq.s32.totalorder %v2673_v34, 3 }
  0xfa   : > { %993 = vperm.xlu0 %2340, %v962_v24  }
  0xfd   : > { %744 = vperm.xlu1 %2341, %v699_v50  }
  0xfe   : > { %999 = vperm.xlu0 %2340, %v964_v51  }
 0x101   : > { %972 = vperm.xlu1 %2341, %v955_v52  }
 0x102   : > { %1005 = vperm.xlu0 %2340, %v966_v53   ;;  %v1235_v53 = vsel %vm1219_vm3, 1, %v2382_v32  ;;  %vm1752_vm3 = vcmp.eq.s32.totalorder %v2619_v3, 4 }
 0x105   : > { %978 = vperm.xlu1 %2341, %v957_v28   ;;  %v1500_v28 = vsel %vm1484_vm4, 1, %v2382_v32  ;;  %vm1489_vm4 = vcmp.eq.s32.totalorder %v2680_v20, 3 }
 0x106   : > { %1011 = vperm.xlu0 %2340, %v968_v29  }
 0x109   : > { %984 = vperm.xlu1 %2341, %v959_v55  }
 0x10a   : > { %1017 = vperm.xlu0 %2340, %v970_v57  }
 0x10d   : > { %990 = vperm.xlu1 %2341, %v961_v58  }
 0x10e   : > { %1245 = vperm.xlu0 %2340, %v1226_v59  }
 0x111   : > { %996 = vperm.xlu1 %2341, %v963_v63  }
 0x112   : > { %1251 = vperm.xlu0 %2340, %v1228_v5   ;;  %v1237_v5 = vsel %vm1221_vm5, 1, %v2382_v32  ;;  %vm1754_vm5 = vcmp.eq.s32.totalorder %v2646_v14, 4  ;;  %v1973_v14 = vld [vmem:[%s3594_s2 + $0x20] sm:$0xff] }
 0x115   : > { %1002 = vperm.xlu1 %2341, %v965_v7   ;;  %v1502_v7 = vsel %vm1486_vm6, 1, %v2382_v32  ;;  %vm1491_vm6 = vcmp.eq.s32.totalorder %v2687_v40, 3 }
 0x116   : > { %1257 = vperm.xlu0 %2340, %v1230_v10  }
 0x119   : > { %1008 = vperm.xlu1 %2341, %v967_v13  }
 0x11a   : > { %1263 = vperm.xlu0 %2340, %v1232_v18  }
 0x11d   : > { %1014 = vperm.xlu1 %2341, %v969_v19  }
 0x11e   : > { %1269 = vperm.xlu0 %2340, %v1234_v16  }
 0x121   : > { %1242 = vperm.xlu1 %2341, %v1225_v27  }
 0x122   : > { %1275 = vperm.xlu0 %2340, %v1236_v31   ;;  %v1239_v31 = vsel %vm1223_vm7, 1, %v2382_v32  ;;  %vm1756_vm7 = vcmp.eq.s32.totalorder %v2666_v30, 4 }
 0x125   : > { %1248 = vperm.xlu1 %2341, %v1227_v33   ;;  %v1504_v33 = vsel %vm1488_vm8, 1, %v2382_v32  ;;  %vm1493_vm8 = vcmp.eq.s32.totalorder %v2694_v47, 3 }
 0x126   : > { %1281 = vperm.xlu0 %2340, %v1238_v35  }
 0x129   : > { %1254 = vperm.xlu1 %2341, %v1229_v36  }
 0x12a   : > { %1287 = vperm.xlu0 %2340, %v1240_v38  }
 0x12d   : > { %1260 = vperm.xlu1 %2341, %v1231_v39  }
 0x12e   : > { %1515 = vperm.xlu0 %2340, %v1496_v45  }
 0x131   : > { %1266 = vperm.xlu1 %2341, %v1233_v46   ;;  %v342_v24 = vpop.xlane.xlu1 %341  ;;  %v339_v50 = vpop.xlane.xlu0 %338 }
 0x132   : > { %v386_v51 = vmul.f32 0.03125, %v342_v24  ;;  %v385_v52 = vmul.f32 0.03125, %v339_v50  ;;  %1521 = vperm.xlu0 %2340, %v1498_v48   ;;  %v1495_v48 = vsel %vm1479_vm9, 1, %v2382_v32  ;;  %v1506_v24 = vsel %vm1490_vm10, 1, %v2382_v32 }
 0x133   : > { %vm1758_vm9 = vcmp.eq.s32.totalorder %v2623_v4, 4  ;;  %vm1749_vm10 = vcmp.eq.s32.totalorder %v2608_v62, 4 }
 0x134   : > { %v402_v29 = vadd.f32 1e-05, %v386_v51  ;;  %v401_v55 = vadd.f32 1e-05, %v385_v52 }
 0x135   : > { %1272 = vperm.xlu1 %2341, %v1235_v53   ;;  %v366_v57 = vpop.xlane.xlu1 %365  ;;  %v363_v58 = vpop.xlane.xlu0 %362 }
 0x136   : > { %2342 = vrsqrt.f32 %v402_v29  ;;  %v394_v59 = vmul.f32 0.03125, %v366_v57  ;;  %v393_v63 = vmul.f32 0.03125, %v363_v58  ;;  %1527 = vperm.xlu0 %2340, %v1500_v28   ;;  %v1508_v58 = vsel %vm1492_vm12, 1, %v2382_v32 }
 0x137   : > { %2344 = vrsqrt.f32 %v401_v55  ;;  %v1497_v55 = vsel %vm1481_vm11, 1, %v2382_v32  ;;  %vm1760_vm11 = vcmp.eq.s32.totalorder %v2639_v9, 4  ;;  %vm1751_vm12 = vcmp.eq.s32.totalorder %v2605_v61, 4 }
 0x138   : > { %v410_v10 = vadd.f32 1e-05, %v394_v59  ;;  %v409_v13 = vadd.f32 1e-05, %v393_v63  ;;  %v1776_v62 = vsel %vm1760_vm11, 1, %v2382_v32 }
 0x139   : > { %1278 = vperm.xlu1 %2341, %v1237_v5   ;;  %v345_v18 = vpop.xlane.xlu1 %344  ;;  %v369_v19 = vpop.xlane.xlu0 %368 }
 0x13a   : > { %2346 = vrsqrt.f32 %v410_v10  ;;  %v387_v16 = vmul.f32 0.03125, %v345_v18  ;;  %v395_v27 = vmul.f32 0.03125, %v369_v19  ;;  %1533 = vperm.xlu0 %2340, %v1502_v7  }
 0x13b   : > { %2348 = vrsqrt.f32 %v409_v13 }
 0x13c   : > { %v403_v35 = vadd.f32 1e-05, %v387_v16  ;;  %v411_v36 = vadd.f32 1e-05, %v395_v27  ;;  %v1499_v27 = vsel %vm1483_vm13, 1, %v2382_v32  ;;  %vm1762_vm13 = vcmp.eq.s32.totalorder %v2649_v15, 4 }
 0x13d   : > { %1284 = vperm.xlu1 %2341, %v1239_v31   ;;  %v348_v38 = vpop.xlane.xlu1 %347  ;;  %v372_v39 = vpop.xlane.xlu0 %371  ;;  %v2019_v15 = vld [vmem:[%s3594_s2 + $0x70] sm:$0xff] }
 0x13e   : > { %2350 = vrsqrt.f32 %v403_v35  ;;  %v388_v45 = vmul.f32 0.03125, %v348_v38  ;;  %v396_v46 = vmul.f32 0.03125, %v372_v39  ;;  %1539 = vperm.xlu0 %2340, %v1504_v33  }
 0x13f   : > { %2352 = vrsqrt.f32 %v411_v36 }
 0x140   : > { %v404_v50 = vadd.f32 1e-05, %v388_v45  ;;  %v412_v51 = vadd.f32 1e-05, %v396_v46 }
 0x141   : > { %1512 = vperm.xlu1 %2341, %v1495_v48   ;;  %v351_v52 = vpop.xlane.xlu1 %350  ;;  %v375_v53 = vpop.xlane.xlu0 %374  ;;  %v1996_v48 = vld [vmem:[%s3594_s2 + $0x48] sm:$0xff] }
 0x142   : > { %2354 = vrsqrt.f32 %v404_v50  ;;  %v389_v28 = vmul.f32 0.03125, %v351_v52  ;;  %v397_v29 = vmul.f32 0.03125, %v375_v53  ;;  %1545 = vperm.xlu0 %2340, %v1506_v24  }
 0x143   : > { %v2343_v57 = vpop.eup %2342  ;;  %2356 = vrsqrt.f32 %v412_v51 }
 0x144   : > { %v2345_v59 = vpop.eup %2344  ;;  %v405_v63 = vadd.f32 1e-05, %v389_v28  ;;  %v413_v5 = vadd.f32 1e-05, %v397_v29  ;;  %v2776_v7 = vmul.f32 %v2343_v57, %v2495_v43  ;;  %v1510_v43 = vsel %vm1494_vm14, 1, %v2382_v32  ;;  %v1975_v29 = vld [vmem:[%s3594_s2 + $0x30] sm:$0xff] }
 0x145   : > { %1518 = vperm.xlu1 %2341, %v1497_v55   ;;  %v354_v10 = vpop.xlane.xlu1 %353  ;;  %v378_v13 = vpop.xlane.xlu0 %377  ;;  %v2780_v18 = vmul.f32 %v2345_v59, %v2497_v44  ;;  %v1997_v44 = vld [vmem:[%s3594_s2 + $0x50] sm:$0xff]  ;;  %vm1753_vm14 = vcmp.eq.s32.totalorder %v2636_v8, 4 }
 0x146   : > { %2358 = vrsqrt.f32 %v405_v63  ;;  %v390_v19 = vmul.f32 0.03125, %v354_v10  ;;  %v398_v16 = vmul.f32 0.03125, %v378_v13  ;;  %1551 = vperm.xlu0 %2340, %v1508_v58   ;;  %v1974_v63 = vld [vmem:[%s3594_s2 + $0x28] sm:$0xff] }
 0x147   : > { %v2347_v31 = vpop.eup %2346  ;;  %2360 = vrsqrt.f32 %v413_v5  ;;  %2171 = vmatprep.mubr.msk.f32.mxu0 %vm239_vm0, %v2780_v18 }
 0x148   : > { %v2349_v33 = vpop.eup %2348  ;;  %v406_v35 = vadd.f32 1e-05, %v390_v19  ;;  %v414_v36 = vadd.f32 1e-05, %v398_v16  ;;  %2172 = vmatmul.mubr.msk.f32.vlgmr.msra.gmra.mxu0 %vm239_vm0, %v2776_v7  ;;  %v2793_v38 = vmul.f32 %v2347_v31, %v2491_v41  ;;  %v1501_v41 = vsel %vm1485_vm15, 1, %v2382_v32  ;;  %v1995_v16 = vld [vmem:[%s3594_s2 + $0x40] sm:$0xff] }
 0x149   : > { %1524 = vperm.xlu1 %2341, %v1499_v27   ;;  %v357_v39 = vpop.xlane.xlu1 %356  ;;  %v381_v45 = vpop.xlane.xlu0 %380  ;;  %v2797_v46 = vmul.f32 %v2349_v33, %v2493_v42  ;;  %2228 = vmatpush3.msra.mxu0 %v2629_v6  ;;  %v1766_v42 = vsel %vm1750_vm1, 1, %v2382_v32  ;;  %v2020_v33 = vld [vmem:[%s3594_s2 + $0x78] sm:$0xff]  ;;  %vm1764_vm15 = vcmp.eq.s32.totalorder %v2659_v23, 4  ;;  %vm1755_vm1 = vcmp.eq.s32.totalorder %v2656_v22, 4  ;;  %v2041_v22 = vld [vmem:[%s3594_s2 + $0x90] sm:$0xff] }
 0x14a   : > { %2362 = vrsqrt.f32 %v406_v35  ;;  %v391_v24 = vmul.f32 0.03125, %v357_v39  ;;  %v399_v50 = vmul.f32 0.03125, %v381_v45  ;;  %1557 = vperm.xlu0 %2340, %v1510_v43   ;;  %2229 = vmatprep.subr.mxu0 %v1997_v44  ;;  %v2042_v35 = vld [vmem:[%s3594_s2 + $0x98] sm:$0xff]  ;;  %v1780_v61 = vsel %vm1764_vm15, 1, %v2382_v32 }
 0x14b   : > { %v2351_v51 = vpop.eup %2350  ;;  %2364 = vrsqrt.f32 %v414_v36  ;;  %2183 = vmatprep.mubr.msk.f32.mxu1 %vm239_vm0, %v2797_v46  ;;  %2230 = vmatpush3.msra.mxu0 %v1997_v44  ;;  %v1771_v23 = vsel %vm1755_vm1, 1, %v2382_v32 }
 0x14c   : > { %v2353_v6 = vpop.eup %2352  ;;  %v407_v52 = vadd.f32 1e-05, %v391_v24  ;;  %v415_v53 = vadd.f32 1e-05, %v399_v50  ;;  %2184 = vmatmul.mubr.msk.f32.vlgmr.msra.gmra.mxu1 %vm239_vm0, %v2793_v38  ;;  %v2815_v28 = vmul.f32 %v2351_v51, %v2508_v54  ;;  %2231 = vmatprep.subr.mxu0 %v1996_v48  ;;  %v1503_v54 = vsel %vm1487_vm2, 1, %v2382_v32 }
 0x14d   : > { %1530 = vperm.xlu1 %2341, %v1501_v41   ;;  %v360_v60 = vpop.xlane.xlu1 %359  ;;  %v384_v55 = vpop.xlane.xlu0 %383  ;;  %v2822_v57 = vmul.f32 %v2353_v6, %v2512_v56  ;;  %2196 = vmatpush3.msra.mxu1 %v2615_v1  ;;  %v1768_v56 = vsel %vm1752_vm3, 1, %v2382_v32  ;;  %v1765_v41 = vsel %vm1749_vm10, 1, %v2382_v32  ;;  %vm1757_vm2 = vcmp.eq.s32.totalorder %v2673_v34, 4  ;;  %v2040_v34 = vld [vmem:[%s3594_s2 + $0x88] sm:$0xff] }
 0x14e   : > { %2366 = vrsqrt.f32 %v407_v52  ;;  %v392_v58 = vmul.f32 0.03125, %v360_v60  ;;  %v400_v59 = vmul.f32 0.03125, %v384_v55  ;;  %1785 = vperm.xlu0 %2340, %v1766_v42   ;;  %2174 = vmatprep.mubr.msk.f32.mxu0 %vm239_vm0, %v2815_v28  ;;  %v1767_v42 = vsel %vm1751_vm12, 1, %v2382_v32  ;;  %v2018_v52 = vld [vmem:[%s3594_s2 + $0x68] sm:$0xff] }
 0x14f   : > { %v2355_v5 = vpop.eup %2354  ;;  %2368 = vrsqrt.f32 %v415_v53  ;;  %2186 = vmatprep.mubr.msk.f32.mxu1 %vm239_vm0, %v2822_v57  ;;  %2197 = vmatprep.subr.mxu1 %v1975_v29  ;;  %v1773_v6 = vsel %vm1757_vm2, 1, %v2382_v32  ;;  %vm1759_vm3 = vcmp.eq.s32.totalorder %v2680_v20, 4  ;;  %v2017_v20 = vld [vmem:[%s3594_s2 + $0x60] sm:$0xff] }
 0x150   : > { %v2357_v1 = vpop.eup %2356  ;;  %v408_v10 = vadd.f32 1e-05, %v392_v58  ;;  %v416_v13 = vadd.f32 1e-05, %v400_v59  ;;  %v2840_v19 = vmul.f32 %v2355_v5, %v2520_v0  ;;  %2198 = vmatpush3.msra.mxu1 %v1975_v29  ;;  %2232 = vmatpush3.msra.mxu0 %v1996_v48  ;;  %v1505_v0 = vsel %vm1489_vm4, 1, %v2382_v32 }
 0x151   : > { %1536 = vperm.xlu1 %2341, %v1503_v54   ;;  %v2847_v3 = vmul.f32 %v2357_v1, %v2524_v2  ;;  %2199 = vmatprep.subr.mxu1 %v1974_v63  ;;  %v1770_v2 = vsel %vm1754_vm5, 1, %v2382_v32  ;;  %v1509_v48 = vsel %vm1493_vm8, 1, %v2382_v32  ;;  %v2939_v8 = vpop.permute.xlu1 %705  ;;  %v1775_v29 = vsel %vm1759_vm3, 1, %v2382_v32 }
 0x152   : > { %2370 = vrsqrt.f32 %v408_v10  ;;  %1791 = vperm.xlu0 %2340, %v1768_v56   ;;  %2175 = vmatmul.mubr.msk.f32.gmra.mxu0 %vm239_vm0, %v2840_v19  ;;  %vm1761_vm4 = vcmp.eq.s32.totalorder %v2687_v40, 4  ;;  %v2039_v40 = vld [vmem:[%s3594_s2 + $0x80] sm:$0xff]  ;;  %vm1763_vm5 = vcmp.eq.s32.totalorder %v2694_v47, 4 }
 0x153   : > { %v2359_v27 = vpop.eup %2358  ;;  %2372 = vrsqrt.f32 %v416_v13  ;;  %2187 = vmatmul.mubr.msk.f32.gmra.mxu1 %vm239_vm0, %v2847_v3  ;;  %2233 = vmatprep.subr.mxu0 %v1995_v16  ;;  %v1777_v55 = vsel %vm1761_vm4, 1, %v2382_v32  ;;  %v1779_v58 = vsel %vm1763_vm5, 1, %v2382_v32 }
 0x154   : > { %v2361_v31 = vpop.eup %2360  ;;  %v2862_v43 = vmul.f32 %v2359_v27, %v2533_v11  ;;  %2200 = vmatpush3.msra.mxu1 %v1974_v63  ;;  %2234 = vmatpush3.msra.mxu0 %v1995_v16  ;;  %v1507_v11 = vsel %vm1491_vm6, 1, %v2382_v32 }
 0x155   : > { %1542 = vperm.xlu1 %2341, %v1505_v0   ;;  %v2866_v44 = vmul.f32 %v2361_v31, %v2536_v12  ;;  %2201 = vmatprep.subr.mxu1 %v1973_v14  ;;  %v1772_v12 = vsel %vm1756_vm7, 1, %v2382_v32  ;;  %v2963_v53 = vpop.permute.xlu1 %708  ;;  %v3044_v54 = vpop.permute.xlu0 %702 }
 0x156   : > { %1797 = vperm.xlu0 %2340, %v1770_v2   ;;  %2177 = vmatprep.mubr.msk.f32.mxu0 %vm239_vm0, %v2862_v43  ;;  %vm749_vm7 = vcmp.eq.s32.totalorder %v3044_v54, 1  ;;  %vm751_vm11 = vcmp.eq.s32.totalorder %v2963_v53, 1 }
 0x157   : > { %v2363_v30 = vpop.eup %2362  ;;  %2189 = vmatprep.mubr.msk.f32.mxu1 %vm239_vm0, %v2866_v44  ;;  %2202 = vmatpush3.msra.mxu1 %v1973_v14 }
 0x158   : > { %v2365_v36 = vpop.eup %2364  ;;  %v2882_v39 = vmul.f32 %v2363_v30, %v2545_v26  ;;  %2259 = vmatprep.subr.mxu1 %v2020_v33  ;;  %2291 = vmatprep.subr.mxu0 %v2042_v35  ;;  %v1774_v26 = vsel %vm1758_vm9, 1, %v2382_v32 }
 0x159   : > { %1548 = vperm.xlu1 %2341, %v1507_v11   ;;  %v2886_v45 = vmul.f32 %v2365_v36, %v2548_v17  ;;  %v2988_v60 = vpop.permute.xlu1 %711 }
 0x15a   : > { %1803 = vperm.xlu0 %2340, %v1772_v12   ;;  %2178 = vmatmul.mubr.msk.f32.gmra.mxu0 %vm239_vm0, %v2882_v39  ;;  %vm752_vm9 = vcmp.eq.s32.totalorder %v2988_v60, 1 }
 0x15b   : > { %v2367_v24 = vpop.eup %2366  ;;  %2190 = vmatmul.mubr.msk.f32.gmra.mxu1 %vm239_vm0, %v2886_v45 }
 0x15c   : > { %v2369_v4 = vpop.eup %2368  ;;  %v2896_v50 = vmul.f32 %v2367_v24, %v2557_v37 }
 0x15d   : > { %1554 = vperm.xlu1 %2341, %v1509_v48   ;;  %v2900_v17 = vmul.f32 %v2369_v4, %v2560_v21  ;;  %v3006_v59 = vpop.permute.xlu1 %714 }
 0x15e   : > { %1809 = vperm.xlu0 %2340, %v1774_v26   ;;  %2180 = vmatprep.mubr.msk.f32.mxu0 %vm239_vm0, %v2896_v50  ;;  %vm753_vm15 = vcmp.eq.s32.totalorder %v3006_v59, 1 }
 0x15f   : > { %v2371_v51 = vpop.eup %2370  ;;  %2192 = vmatprep.mubr.msk.f32.mxu1 %vm239_vm0, %v2900_v17 }
 0x160   : > { %v2373_v37 = vpop.eup %2372  ;;  %v2910_v9 = vmul.f32 %v2371_v51, %v2569_v49  ;;  %v1778_v49 = vsel %vm1762_vm13, 1, %v2382_v32 }
 0x161   : > { %1782 = vperm.xlu1 %2341, %v1765_v41   ;;  %v2914_v21 = vmul.f32 %v2373_v37, %v2572_v25  ;;  %v1769_v25 = vsel %vm1753_vm14, 1, %v2382_v32  ;;  %v3022_v32 = vpop.permute.xlu1 %717 }
 0x162   : > { %1815 = vperm.xlu0 %2340, %v1776_v62   ;;  %2181 = vmatmul.mubr.msk.f32.gmra.mxu0 %vm239_vm0, %v2910_v9  ;;  %vm754_vm13 = vcmp.eq.s32.totalorder %v3022_v32, 1 }
 0x163   : > { %2193 = vmatmul.mubr.msk.f32.gmra.mxu1 %vm239_vm0, %v2914_v21  ;;  %2235 = vmatprep.mubr.msk.f32.mxu0 %vm239_vm0, %v2780_v18 }
 0x164   : > { %2203 = vmatprep.mubr.msk.f32.mxu1 %vm239_vm0, %v2780_v18 }
 0x165   : > { %1788 = vperm.xlu1 %2341, %v1767_v42   ;;  %v3034_v47 = vpop.permute.xlu1 %720 }
 0x166   : > { %1821 = vperm.xlu0 %2340, %v1778_v49   ;;  %2236 = vmatmul.mubr.msk.f32.vlgmr.msra.gmra.mxu0 %vm239_vm0, %v2776_v7  ;;  %vm755_vm4 = vcmp.eq.s32.totalorder %v3034_v47, 1 }
 0x167   : > { %2204 = vmatmul.mubr.msk.f32.vlgmr.msra.gmra.mxu1 %vm239_vm0, %v2776_v7  ;;  %2238 = vmatprep.mubr.msk.f32.mxu0 %vm239_vm0, %v2815_v28 }
 0x168   : > { %2260 = vmatpush3.msra.mxu1 %v2020_v33  ;;  %2206 = vmatprep.mubr.msk.f32.mxu1 %vm239_vm0, %v2815_v28 }
 0x169   : > { %2292 = vmatpush3.msra.mxu0 %v2042_v35  ;;  %1794 = vperm.xlu1 %2341, %v1769_v25  }
 0x16a   : > { %1827 = vperm.xlu0 %2340, %v1780_v61   ;;  %2239 = vmatmul.mubr.msk.f32.gmra.mxu0 %vm239_vm0, %v2840_v19 }
 0x16b   : > { %2207 = vmatmul.mubr.msk.f32.gmra.mxu1 %vm239_vm0, %v2840_v19  ;;  %2241 = vmatprep.mubr.msk.f32.mxu0 %vm239_vm0, %v2862_v43 }
 0x16c   : > { %2209 = vmatprep.mubr.msk.f32.mxu1 %vm239_vm0, %v2862_v43  ;;  %2261 = vmatprep.subr.mxu1 %v2019_v15 }
 0x16d   : > { %1800 = vperm.xlu1 %2341, %v1771_v23   ;;  %2262 = vmatpush3.msra.mxu1 %v2019_v15 }
 0x16e   : > { %2242 = vmatmul.mubr.msk.f32.gmra.mxu0 %vm239_vm0, %v2882_v39  ;;  %2293 = vmatprep.subr.mxu0 %v2041_v22 }
 0x16f   : > { %2210 = vmatmul.mubr.msk.f32.gmra.mxu1 %vm239_vm0, %v2882_v39  ;;  %2244 = vmatprep.mubr.msk.f32.mxu0 %vm239_vm0, %v2896_v50 }
 0x170   : > { %2212 = vmatprep.mubr.msk.f32.mxu1 %vm239_vm0, %v2896_v50  ;;  %2294 = vmatpush3.msra.mxu0 %v2041_v22 }
 0x171   : > { %1806 = vperm.xlu1 %2341, %v1773_v6   ;;  %2263 = vmatprep.subr.mxu1 %v2018_v52 }
 0x172   : > { %2245 = vmatmul.mubr.msk.f32.gmra.mxu0 %vm239_vm0, %v2910_v9  ;;  %2264 = vmatpush3.msra.mxu1 %v2018_v52 }
 0x173   : > { %2213 = vmatmul.mubr.msk.f32.gmra.mxu1 %vm239_vm0, %v2910_v9  ;;  %2247 = vmatprep.mubr.msk.f32.mxu0 %vm239_vm0, %v2797_v46 }
 0x174   : > { %2215 = vmatprep.mubr.msk.f32.mxu1 %vm239_vm0, %v2797_v46  ;;  %2295 = vmatprep.subr.mxu0 %v2040_v34 }
 0x175   : > { %1812 = vperm.xlu1 %2341, %v1775_v29   ;;  %2296 = vmatpush3.msra.mxu0 %v2040_v34 }
 0x176   : > { %2248 = vmatmul.mubr.msk.f32.gmra.mxu0 %vm239_vm0, %v2793_v38  ;;  %2265 = vmatprep.subr.mxu1 %v2017_v20 }
 0x177   : > { %2216 = vmatmul.mubr.msk.f32.gmra.mxu1 %vm239_vm0, %v2793_v38  ;;  %2250 = vmatprep.mubr.msk.f32.mxu0 %vm239_vm0, %v2822_v57 }
 0x178   : > { %2218 = vmatprep.mubr.msk.f32.mxu1 %vm239_vm0, %v2822_v57  ;;  %2266 = vmatpush3.msra.mxu1 %v2017_v20 }
 0x179   : > { %1818 = vperm.xlu1 %2341, %v1777_v55   ;;  %2297 = vmatprep.subr.mxu0 %v2039_v40 }
 0x17a   : > { %2251 = vmatmul.mubr.msk.f32.gmra.mxu0 %vm239_vm0, %v2847_v3 }
 0x17b   : > { %2219 = vmatmul.mubr.msk.f32.gmra.mxu1 %vm239_vm0, %v2847_v3  ;;  %2253 = vmatprep.mubr.msk.f32.mxu0 %vm239_vm0, %v2866_v44 }
 0x17c   : > { %2221 = vmatprep.mubr.msk.f32.mxu1 %vm239_vm0, %v2866_v44  ;;  %2298 = vmatpush3.msra.mxu0 %v2039_v40 }
 0x17d   : > { %1824 = vperm.xlu1 %2341, %v1779_v58  }
 0x17e   : > { %2254 = vmatmul.mubr.msk.f32.gmra.mxu0 %vm239_vm0, %v2886_v45 }
 0x17f   : > { %2222 = vmatmul.mubr.msk.f32.gmra.mxu1 %vm239_vm0, %v2886_v45  ;;  %2256 = vmatprep.mubr.msk.f32.mxu0 %vm239_vm0, %v2900_v17 }
 0x180   : > { %2224 = vmatprep.mubr.msk.f32.mxu1 %vm239_vm0, %v2900_v17 }
 0x182   : > { %2257 = vmatmul.mubr.msk.f32.gmra.mxu0 %vm239_vm0, %v2914_v21 }
 0x183   : > { %2225 = vmatmul.mubr.msk.f32.gmra.mxu1 %vm239_vm0, %v2914_v21  ;;  %2299 = vmatprep.mubr.msk.f32.mxu0 %vm239_vm0, %v2780_v18 }
 0x184   : > { %2267 = vmatprep.mubr.msk.f32.mxu1 %vm239_vm0, %v2780_v18  ;;  %v3062_v18 = vpop.permute.xlu0 %729 }
 0x186   : > { %2300 = vmatmul.mubr.msk.f32.vlgmr.msra.gmra.mxu0 %vm239_vm0, %v2776_v7 }
 0x187   : > { %2268 = vmatmul.mubr.msk.f32.vlgmr.msra.gmra.mxu1 %vm239_vm0, %v2776_v7  ;;  %2302 = vmatprep.mubr.msk.f32.mxu0 %vm239_vm0, %v2815_v28  ;;  %v3052_v7 = vpop.permute.xlu1 %723 }
 0x188   : > { %2270 = vmatprep.mubr.msk.f32.mxu1 %vm239_vm0, %v2815_v28  ;;  %v3076_v63 = vpop.permute.xlu0 %735  ;;  %vm756_vm2 = vcmp.eq.s32.totalorder %v3052_v7, 1 }
 0x18a   : > { %2303 = vmatmul.mubr.msk.f32.gmra.mxu0 %vm239_vm0, %v2840_v19 }
 0x18b   : > { %2271 = vmatmul.mubr.msk.f32.gmra.mxu1 %vm239_vm0, %v2840_v19  ;;  %2305 = vmatprep.mubr.msk.f32.mxu0 %vm239_vm0, %v2862_v43  ;;  %v3066_v28 = vpop.permute.xlu1 %726 }
 0x18c   : > { %2273 = vmatprep.mubr.msk.f32.mxu1 %vm239_vm0, %v2862_v43 }
 0x18e   : > { %2306 = vmatmul.mubr.msk.f32.gmra.mxu0 %vm239_vm0, %v2882_v39 }
 0x18f   : > { %2274 = vmatmul.mubr.msk.f32.gmra.mxu1 %vm239_vm0, %v2882_v39  ;;  %2308 = vmatprep.mubr.msk.f32.mxu0 %vm239_vm0, %v2896_v50  ;;  %v3084_v5 = vpop.permute.xlu1 %732 }
 0x190   : > { %2276 = vmatprep.mubr.msk.f32.mxu1 %vm239_vm0, %v2896_v50 }
 0x192   : > { %2309 = vmatmul.mubr.msk.f32.gmra.mxu0 %vm239_vm0, %v2910_v9 }
 0x193   : > { %2277 = vmatmul.mubr.msk.f32.gmra.mxu1 %vm239_vm0, %v2910_v9  ;;  %2311 = vmatprep.mubr.msk.f32.mxu0 %vm239_vm0, %v2797_v46 }
 0x194   : > { %2279 = vmatprep.mubr.msk.f32.mxu1 %vm239_vm0, %v2797_v46  ;;  %v3098_v46 = vpop.permute.xlu1 %738 }
 0x196   : > { %2312 = vmatmul.mubr.msk.f32.gmra.mxu0 %vm239_vm0, %v2793_v38 }
 0x197   : > { %2280 = vmatmul.mubr.msk.f32.gmra.mxu1 %vm239_vm0, %v2793_v38  ;;  %2314 = vmatprep.mubr.msk.f32.mxu0 %vm239_vm0, %v2822_v57  ;;  %v3094_v38 = vpop.permute.xlu0 %741 }
 0x198   : > { %2282 = vmatprep.mubr.msk.f32.mxu1 %vm239_vm0, %v2822_v57  ;;  %v3112_v56 = vpop.permute.xlu1 %744 }
 0x19a   : > { %2315 = vmatmul.mubr.msk.f32.gmra.mxu0 %vm239_vm0, %v2847_v3 }
 0x19b   : > { %2283 = vmatmul.mubr.msk.f32.gmra.mxu1 %vm239_vm0, %v2847_v3  ;;  %2317 = vmatprep.mubr.msk.f32.mxu0 %vm239_vm0, %v2866_v44  ;;  %v3108_v57 = vpop.permute.xlu0 %747 }
 0x19c   : > { %2285 = vmatprep.mubr.msk.f32.mxu1 %vm239_vm0, %v2866_v44  ;;  %v3116_v10 = vpop.permute.xlu1 %972 }
 0x19d   : > { %vm1019_vm8 = vcmp.eq.s32.totalorder %v3116_v10, 1 }
 0x19e   : > { %2318 = vmatmul.mubr.msk.f32.gmra.mxu0 %vm239_vm0, %v2886_v45 }
 0x19f   : > { %2286 = vmatmul.mubr.msk.f32.gmra.mxu1 %vm239_vm0, %v2886_v45  ;;  %2320 = vmatprep.mubr.msk.f32.mxu0 %vm239_vm0, %v2900_v17  ;;  %v3114_v1 = vpop.permute.xlu0 %975 }
 0x1a0   : > { %2288 = vmatprep.mubr.msk.f32.mxu1 %vm239_vm0, %v2900_v17  ;;  %v3120_v19 = vpop.permute.xlu1 %978  ;;  %vm1020_vm6 = vcmp.eq.s32.totalorder %v3114_v1, 1 }
 0x1a1   : > { %vm1021_vm12 = vcmp.eq.s32.totalorder %v3120_v19, 1 }
 0x1a2   : > { %2321 = vmatmul.mubr.msk.f32.gmra.mxu0 %vm239_vm0, %v2914_v21 }
 0x1a3   : > { %2289 = vmatmul.mubr.msk.f32.gmra.mxu1 %vm239_vm0, %v2914_v21  ;;  %v3118_v13 = vpop.permute.xlu0 %981  ;;  %vm750_vm0 = vcmp.eq.s32.totalorder %v2939_v8, 1 }
 0x1a4   : > { %v3124_v3 = vpop.permute.xlu1 %984  ;;  %vm1022_vm10 = vcmp.eq.s32.totalorder %v3118_v13, 1 }
 0x1a5   : > { %vm1023_vm1 = vcmp.eq.s32.totalorder %v3124_v3, 1 }
 0x1a7   : > { %v3122_v16 = vpop.permute.xlu0 %987 }
 0x1a8   : > { %v3128_v14 = vpop.permute.xlu1 %990  ;;  %vm1024_vm14 = vcmp.eq.s32.totalorder %v3122_v16, 1 }
 0x1a9   : > { %vm1025_vm5 = vcmp.eq.s32.totalorder %v3128_v14, 1 }
 0x1ab   : > { %v3126_v0 = vpop.permute.xlu0 %993 }
 0x1ac   : > { %v3132_v2 = vpop.permute.xlu1 %996  ;;  %vm1026_vm3 = vcmp.eq.s32.totalorder %v3126_v0, 1 }
 0x1af   : > { %v3130_v27 = vpop.permute.xlu0 %999 }
 0x1b0   : > { %v3136_v43 = vpop.permute.xlu1 %1002 }
 0x1b3   : > { %v3134_v31 = vpop.permute.xlu0 %1005 }
 0x1b4   : > { %v3140_v33 = vpop.permute.xlu1 %1008 }
 0x1b7   : > { %v3138_v44 = vpop.permute.xlu0 %1011 }
 0x1b8   : > { %v3144_v11 = vpop.permute.xlu1 %1014 }
 0x1bb   : > { %v3142_v35 = vpop.permute.xlu0 %1017 }
 0x1bc   : > { %v3148_v12 = vpop.permute.xlu1 %1242 }
 0x1bd   : > { %3613 = vst [vmem:[#allocation2_spill] sm:$0xff] %v3148_v12 }
 0x1bf   : > { %v3146_v30 = vpop.permute.xlu0 %1245 }
 0x1c0   : > { %v3152_v39 = vpop.permute.xlu1 %1248 }
 0x1c1   : > { %3614 = vst [vmem:[#allocation3_spill] sm:$0xff] %v3152_v39 }
 0x1c3   : > { %v3150_v36 = vpop.permute.xlu0 %1251 }
 0x1c4   : > { %v3156_v48 = vpop.permute.xlu1 %1254 }
 0x1c5   : > { %3615 = vst [vmem:[#allocation4_spill] sm:$0xff] %v3156_v48 }
 0x1c7   : > { %v3154_v45 = vpop.permute.xlu0 %1257 }
 0x1c8   : > { %v3160_v26 = vpop.permute.xlu1 %1260 }
 0x1c9   : > { %3617 = vst [vmem:[#allocation6_spill] sm:$0xff] %v3160_v26 }
 0x1cb   : > { %v3158_v24 = vpop.permute.xlu0 %1263 }
 0x1cc   : > { %3616 = vst [vmem:[#allocation5_spill] sm:$0xff] %v3158_v24  ;;  %v3164_v50 = vpop.permute.xlu1 %1266 }
 0x1cd   : > { %3619 = vst [vmem:[#allocation8_spill] sm:$0xff] %v3164_v50 }
 0x1cf   : > { %v3162_v4 = vpop.permute.xlu0 %1269 }
 0x1d0   : > { %3618 = vst [vmem:[#allocation7_spill] sm:$0xff] %v3162_v4  ;;  %v3168_v41 = vpop.permute.xlu1 %1272 }
 0x1d1   : > { %3621 = vst [vmem:[#allocation10_spill] sm:$0xff] %v3168_v41 }
 0x1d3   : > { %v3166_v17 = vpop.permute.xlu0 %1275 }
 0x1d4   : > { %3620 = vst [vmem:[#allocation9_spill] sm:$0xff] %v3166_v17  ;;  %v3172_v62 = vpop.permute.xlu1 %1278  ;;  %v3211_v17 = vld [vmem:[%s3595_s3] ss:$0 sm:$0xff] }
 0x1d5   : > { %3623 = vst [vmem:[#allocation12_spill] sm:$0xff] %v3172_v62 }
 0x1d7   : > { %v3170_v51 = vpop.permute.xlu0 %1281 }
 0x1d8   : > { %3622 = vst [vmem:[#allocation11_spill] sm:$0xff] %v3170_v51  ;;  %v3176_v9 = vpop.permute.xlu1 %1284 }
 0x1d9   : > { %3625 = vst [vmem:[#allocation14_spill] sm:$0xff] %v3176_v9 }
 0x1db   : > { %v3174_v37 = vpop.permute.xlu0 %1287 }
 0x1dc   : > { %3624 = vst [vmem:[#allocation13_spill] sm:$0xff] %v3174_v37  ;;  %v3180_v42 = vpop.permute.xlu1 %1512 }
 0x1dd   : > { %3627 = vst [vmem:[#allocation16_spill] sm:$0xff] %v3180_v42 }
 0x1df   : > { %v3178_v21 = vpop.permute.xlu0 %1515 }
 0x1e0   : > { %3626 = vst [vmem:[#allocation15_spill] sm:$0xff] %v3178_v21  ;;  %v3184_v61 = vpop.permute.xlu1 %1518 }
 0x1e1   : > { %3629 = vst [vmem:[#allocation18_spill] sm:$0xff] %v3184_v61 }
 0x1e3   : > { %v3182_v49 = vpop.permute.xlu0 %1521 }
 0x1e4   : > { %3628 = vst [vmem:[#allocation17_spill] sm:$0xff] %v3182_v49  ;;  %v3192_v34 = vpop.permute.xlu1 %1524 }
 0x1e5   : > { %3631 = vst [vmem:[#allocation20_spill] sm:$0xff] %v3192_v34 }
 0x1e7   : > { %v3188_v22 = vpop.permute.xlu0 %1527 }
 0x1e8   : > { %3630 = vst [vmem:[#allocation19_spill] sm:$0xff] %v3188_v22  ;;  %v3200_v9 = vpop.permute.xlu1 %1530 }
 0x1e9   : > { %3633 = vst [vmem:[#allocation22_spill] sm:$0xff] %v3200_v9 }
 0x1eb   : > { %v3196_v55 = vpop.permute.xlu0 %1533 }
 0x1ec   : > { %3632 = vst [vmem:[#allocation21_spill] sm:$0xff] %v3196_v55  ;;  %v3213_v50 = vpop.permute.xlu1 %1536 }
 0x1ed   : > { %3635 = vst [vmem:[#allocation24_spill] sm:$0xff] %v3213_v50 }
 0x1ef   : > { %v3204_v51 = vpop.permute.xlu0 %1539 }
 0x1f0   : > { %3634 = vst [vmem:[#allocation23_spill] sm:$0xff] %v3204_v51  ;;  %v3223_v51 = vld [vmem:[%s3595_s3 + $0x1] ss:$0 sm:$0xff] }
 0x1f3   : > { %v3227_v26 = vpop.permute.xlu0 %1545 }
 0x1f4   : > { %3636 = vst [vmem:[#allocation25_spill] sm:$0xff] %v3227_v26 }
 0x1f7   : > { %v3253_v54 = vpop.permute.xlu0 %1551 }
 0x1fb   : > { %v3281_v32 = vpop.permute.xlu0 %1557 }
 0x208   : > { %v2173_v25 = vpop.f32.mrf.mxu0 }
 0x209   : > { %v596_v9 = vadd.f32 %v2173_v25, %v3211_v17  ;;  %v3235_v25 = vpop.permute.xlu1 %1542 }
 0x20a   : > { %v590_v23 = vpop.f32.mrf.mxu0  ;;  %3637 = vst [vmem:[#allocation26_spill] sm:$0xff] %v3235_v25 }
 0x20b   : > { %v591_v49 = vadd.f32 %v3211_v17, %v590_v23  ;;  %v766_v48 = vsel %vm750_vm0, %v596_v9, 0.0  ;;  %vm758_vm0 = vcmp.eq.s32.totalorder %v3062_v18, 1 }
 0x20c   : > { %v3186_v15 = vpop.f32.mrf.mxu1 }
 0x20d   : > { %v765_v8 = vsel %vm749_vm7, %v591_v49, 0.0  ;;  %v636_v3 = vadd.f32 %v3186_v15, %v3211_v17  ;;  %vm757_vm7 = vcmp.eq.s32.totalorder %v3066_v28, 1 }
 0x20e   : > { %v3190_v6 = vpop.f32.mrf.mxu1 }
 0x20f   : > { %v631_v0 = vadd.f32 %v3211_v17, %v3190_v6 }
 0x212   : > { %v2176_v52 = vpop.f32.mrf.mxu0 }
 0x213   : > { %v3194_v29 = vpop.f32.mrf.mxu1  ;;  %v606_v21 = vadd.f32 %v2176_v52, %v3211_v17 }
 0x214   : > { %v600_v20 = vpop.f32.mrf.mxu0  ;;  %v646_v14 = vadd.f32 %v3194_v29, %v3211_v17 }
 0x215   : > { %v3198_v40 = vpop.f32.mrf.mxu1 }
 0x21a   : > { %v2179_v58 = vpop.f32.mrf.mxu0 }
 0x21b   : > { %v3202_v37 = vpop.f32.mrf.mxu1 }
 0x21c   : > { %v610_v62 = vpop.f32.mrf.mxu0 }
 0x21d   : > { %v3206_v41 = vpop.f32.mrf.mxu1  ;;  %v611_v13 = vadd.f32 %v3211_v17, %v610_v62 }
 0x222   : > { %v2182_v34 = vpop.f32.mrf.mxu0 }
 0x223   : > { %v3215_v55 = vpop.f32.mrf.mxu1 }
 0x224   : > { %v620_v22 = vpop.f32.mrf.mxu0 }
 0x225   : > { %v3218_v4 = vpop.f32.mrf.mxu1 }
 0x226   : > { %v3225_v61 = vpop.f32.mrf.mxu0 }
 0x227   : > { %v2205_v24 = vpop.f32.mrf.mxu1 }
 0x228   : > { %v866_v50 = vadd.f32 %v2205_v24, %v3223_v51  ;;  %v3232_v42 = vpop.f32.mrf.mxu0  ;;  %v601_v24 = vadd.f32 %v3211_v17, %v600_v20  ;;  %v3263_v20 = vpop.permute.xlu1 %1548 }
 0x229   : > { %v860_v39 = vpop.f32.mrf.mxu1 }
 0x22a   : > { %v3239_v26 = vsel %vm1020_vm6, %v866_v50, %v766_v48  ;;  %v861_v23 = vadd.f32 %v3223_v51, %v860_v39  ;;  %v3242_v12 = vpop.f32.mrf.mxu0  ;;  %v768_v39 = vsel %vm752_vm9, %v606_v21, 0.0  ;;  %v616_v48 = vadd.f32 %v2179_v58, %v3211_v17 }
 0x22b   : > { %v2208_v1 = vpop.f32.mrf.mxu1  ;;  %vm1028_vm6 = vcmp.eq.s32.totalorder %v3130_v27, 1  ;;  %v773_v27 = vsel %vm757_vm7, %v631_v0, 0.0  ;;  %vm760_vm9 = vcmp.eq.s32.totalorder %v3076_v63, 1  ;;  %vm1294_vm7 = vcmp.eq.s32.totalorder %v3154_v45, 1 }
 0x22c   : > { %v3247_v9 = vsel %vm1019_vm8, %v861_v23, %v765_v8  ;;  %v876_v52 = vadd.f32 %v2208_v1, %v3223_v51  ;;  %v3250_v25 = vpop.f32.mrf.mxu0  ;;  %v767_v23 = vsel %vm751_vm11, %v601_v24, 0.0  ;;  %v770_v1 = vsel %vm754_vm13, %v616_v48, 0.0 }
 0x22d   : > { %v870_v10 = vpop.f32.mrf.mxu1  ;;  %vm1027_vm8 = vcmp.eq.s32.totalorder %v3132_v2, 1  ;;  %v656_v2 = vadd.f32 %v3202_v37, %v3211_v17  ;;  %vm759_vm11 = vcmp.eq.s32.totalorder %v3084_v5, 1  ;;  %vm762_vm13 = vcmp.eq.s32.totalorder %v3094_v38, 1  ;;  %v3361_v38 = vld [vmem:[%s3595_s3 + $0x2] ss:$0 sm:$0xff] }
 0x22e   : > { %v3257_v50 = vsel %vm1022_vm10, %v876_v52, %v768_v39  ;;  %v871_v60 = vadd.f32 %v3223_v51, %v870_v10  ;;  %v3260_v49 = vpop.f32.mrf.mxu0  ;;  %v626_v52 = vadd.f32 %v2182_v34, %v3211_v17  ;;  %v769_v10 = vsel %vm753_vm15, %v611_v13, 0.0 }
 0x22f   : > { %v2211_v8 = vpop.f32.mrf.mxu1  ;;  %vm1030_vm10 = vcmp.eq.s32.totalorder %v3134_v31, 1  ;;  %v651_v31 = vadd.f32 %v3211_v17, %v3206_v41  ;;  %vm761_vm15 = vcmp.eq.s32.totalorder %v3098_v46, 1 }
 0x230   : > { %v3267_v21 = vsel %vm1021_vm12, %v871_v60, %v767_v23  ;;  %v886_v53 = vadd.f32 %v2211_v8, %v3223_v51  ;;  %v3270_v58 = vpop.f32.mrf.mxu0  ;;  %v621_v60 = vadd.f32 %v3211_v17, %v620_v22  ;;  %v3291_v23 = vpop.permute.xlu1 %1554  ;;  %v772_v8 = vsel %vm756_vm2, %v626_v52, 0.0 }
 0x231   : > { %v880_v19 = vpop.f32.mrf.mxu1  ;;  %vm1029_vm12 = vcmp.eq.s32.totalorder %v3136_v43, 1  ;;  %v778_v43 = vsel %vm762_vm13, %v656_v2, 0.0  ;;  %vm764_vm2 = vcmp.eq.s32.totalorder %v3108_v57, 1  ;;  %v1136_v57 = vadd.f32 %v3225_v61, %v3361_v38 }
 0x232   : > { %v3275_v24 = vsel %vm1024_vm14, %v886_v53, %v770_v1  ;;  %v881_v62 = vadd.f32 %v3223_v51, %v880_v19  ;;  %v3278_v39 = vpop.f32.mrf.mxu0  ;;  %v771_v1 = vsel %vm755_vm4, %v621_v60, 0.0  ;;  %vm1032_vm14 = vcmp.eq.s32.totalorder %v3138_v44, 1 }
 0x233   : > { %v2214_v16 = vpop.f32.mrf.mxu1  ;;  %v777_v44 = vsel %vm761_vm15, %v651_v31, 0.0  ;;  %vm1034_vm4 = vcmp.eq.s32.totalorder %v3142_v35, 1 }
 0x234   : > { %v3285_v34 = vsel %vm1023_vm1, %v881_v62, %v769_v10  ;;  %v896_v59 = vadd.f32 %v2214_v16, %v3223_v51  ;;  %v3288_v48 = vpop.f32.mrf.mxu0  ;;  %v3311_v62 = vpop.permute.xlu0 %1785  ;;  %v774_v10 = vsel %vm758_vm0, %v636_v3, 0.0  ;;  %v641_v3 = vadd.f32 %v3211_v17, %v3198_v40 }
 0x235   : > { %v890_v13 = vpop.f32.mrf.mxu1  ;;  %vm1031_vm1 = vcmp.eq.s32.totalorder %v3140_v33, 1  ;;  %vm1292_vm0 = vcmp.eq.s32.totalorder %v3150_v36, 1  ;;  %vm1830_vm13 = vcmp.eq.s32.totalorder %v3311_v62, 1  ;;  %v3644_v62 = vld [vmem:[#allocation17_spill] sm:$0xff] }
 0x236   : > { %v3296_v22 = vsel %vm1026_vm3, %v896_v59, %v772_v8  ;;  %v891_v7 = vadd.f32 %v3223_v51, %v890_v13  ;;  %v3299_v53 = vpop.f32.mrf.mxu0  ;;  %v3322_v59 = vpop.permute.xlu1 %1782  ;;  %vm763_vm3 = vcmp.eq.s32.totalorder %v3112_v56, 1  ;;  %vm1562_vm15 = vcmp.eq.s32.totalorder %v3644_v62, 1 }
 0x237   : > { %v2217_v19 = vpop.f32.mrf.mxu1 }
 0x238   : > { %v3305_v15 = vsel %vm1025_vm5, %v891_v7, %v771_v1  ;;  %v906_v52 = vadd.f32 %v2217_v19, %v3223_v51  ;;  %v3308_v47 = vpop.f32.mrf.mxu0  ;;  %v776_v7 = vsel %vm760_vm9, %v646_v14, 0.0  ;;  %v3342_v19 = vpop.permute.xlu0 %1791  ;;  %vm1290_vm5 = vcmp.eq.s32.totalorder %v3146_v30, 1 }
 0x239   : > { %v900_v16 = vpop.f32.mrf.mxu1 }
 0x23a   : > { %v3316_v6 = vsel %vm1028_vm6, %v906_v52, %v774_v10  ;;  %v901_v18 = vadd.f32 %v3223_v51, %v900_v16  ;;  %v3319_v60 = vpop.f32.mrf.mxu0  ;;  %v775_v52 = vsel %vm759_vm11, %v641_v3, 0.0  ;;  %v3353_v16 = vpop.permute.xlu1 %1788  ;;  %vm1033_vm6 = vcmp.eq.s32.totalorder %v3144_v11, 1 }
 0x23b   : > { %v2220_v8 = vpop.f32.mrf.mxu1 }
 0x23c   : > { %v3327_v29 = vsel %vm1027_vm8, %v901_v18, %v773_v27  ;;  %v916_v28 = vadd.f32 %v2220_v8, %v3223_v51  ;;  %v3330_v13 = vpop.f32.mrf.mxu0  ;;  %v666_v18 = vadd.f32 %v3215_v55, %v3211_v17  ;;  %v661_v55 = vadd.f32 %v3211_v17, %v3218_v4  ;;  %v3384_v33 = vpop.permute.xlu0 %1797 }
 0x23d   : > { %v910_v1 = vpop.f32.mrf.mxu1 }
 0x23e   : > { %v3336_v0 = vsel %vm1030_vm10, %v916_v28, %v776_v7  ;;  %v911_v40 = vadd.f32 %v3223_v51, %v910_v1  ;;  %v3339_v63 = vpop.f32.mrf.mxu0  ;;  %v3380_v1 = vld [vmem:[%s3595_s3 + $0x4] ss:$0 sm:$0xff]  ;;  %v780_v4 = vsel %vm764_vm2, %v666_v18, 0.0  ;;  %v3399_v31 = vpop.permute.xlu1 %1794  ;;  %v779_v61 = vsel %vm763_vm3, %v661_v55, 0.0 }
 0x23f   : > { %v2223_v10 = vpop.f32.mrf.mxu1  ;;  %v3638_v18 = vld [vmem:[#allocation2_spill] sm:$0xff]  ;;  %v1146_v55 = vadd.f32 %v3242_v12, %v3361_v38  ;;  %v1141_v12 = vadd.f32 %v3361_v38, %v3250_v25 }
 0x240   : > { %v3347_v37 = vsel %vm1029_vm12, %v911_v40, %v775_v52  ;;  %v926_v5 = vadd.f32 %v2223_v10, %v3223_v51  ;;  %v3350_v14 = vpop.f32.mrf.mxu0  ;;  %v3391_v40 = vld [vmem:[%s3595_s3 + $0x3] ss:$0 sm:$0xff]  ;;  %v1131_v10 = vadd.f32 %v3361_v38, %v3232_v42  ;;  %vm1289_vm8 = vcmp.eq.s32.totalorder %v3638_v18, 1  ;;  %v3640_v42 = vld [vmem:[#allocation15_spill] sm:$0xff] }
 0x241   : > { %v920_v27 = vpop.f32.mrf.mxu1  ;;  %vm1560_vm10 = vcmp.eq.s32.totalorder %v3640_v42, 1  ;;  %v3643_v42 = vld [vmem:[#allocation5_spill] sm:$0xff]  ;;  %v1308_v25 = vsel %vm1292_vm0, %v1146_v55, %v3257_v50  ;;  %v1151_v55 = vadd.f32 %v3361_v38, %v3270_v58 }
 0x242   : > { %v3363_v41 = vsel %vm1032_vm14, %v926_v5, %v778_v43  ;;  %v921_v3 = vadd.f32 %v3223_v51, %v920_v27  ;;  %v3366_v8 = vpop.f32.mrf.mxu0  ;;  %v3639_v27 = vld [vmem:[#allocation3_spill] sm:$0xff]  ;;  %v1305_v30 = vsel %vm1289_vm8, %v1131_v10, %v3247_v9  ;;  %vm1296_vm14 = vcmp.eq.s32.totalorder %v3643_v42, 1  ;;  %v3440_v9 = vpop.permute.xlu1 %1800 }
 0x243   : > { %v2226_v28 = vpop.f32.mrf.mxu1  ;;  %vm1291_vm9 = vcmp.eq.s32.totalorder %v3639_v27, 1  ;;  %v1156_v10 = vadd.f32 %v3260_v49, %v3361_v38 }
 0x244   : > { %v3372_v46 = vsel %vm1031_vm1, %v921_v3, %v777_v44  ;;  %v936_v7 = vadd.f32 %v2226_v28, %v3223_v51  ;;  %v3375_v2 = vpop.f32.mrf.mxu0  ;;  %v1306_v44 = vsel %vm1290_vm5, %v1136_v57, %v3239_v26  ;;  %vm1829_vm1 = vcmp.eq.s32.totalorder %v3322_v59, 1  ;;  %v3646_v59 = vld [vmem:[#allocation18_spill] sm:$0xff] }
 0x245   : > { %v930_v17 = vpop.f32.mrf.mxu1  ;;  %vm1561_vm3 = vcmp.eq.s32.totalorder %v3646_v59, 1  ;;  %v1307_v49 = vsel %vm1291_vm9, %v1141_v12, %v3267_v21  ;;  %v1310_v58 = vsel %vm1294_vm7, %v1156_v10, %v3275_v24  ;;  %v1166_v12 = vadd.f32 %v3278_v39, %v3361_v38  ;;  %v3651_v59 = vld [vmem:[#allocation9_spill] sm:$0xff] }
 0x246   : > { %v3395_v56 = vsel %vm1034_vm4, %v936_v7, %v780_v4  ;;  %v931_v35 = vadd.f32 %v3223_v51, %v930_v17  ;;  %v2301_v52 = vpop.f32.mrf.mxu0  ;;  %v3641_v4 = vld [vmem:[#allocation4_spill] sm:$0xff]  ;;  %vm1832_vm4 = vcmp.eq.s32.totalorder %v3342_v19, 1  ;;  %v3648_v19 = vld [vmem:[#allocation19_spill] sm:$0xff]  ;;  %v3481_v10 = vpop.permute.xlu1 %1806  ;;  %vm1300_vm7 = vcmp.eq.s32.totalorder %v3651_v59, 1 }
 0x247   : > { %v2269_v5 = vpop.f32.mrf.mxu1  ;;  %v1676_v43 = vadd.f32 %v2301_v52, %v3380_v1  ;;  %vm1293_vm11 = vcmp.eq.s32.totalorder %v3641_v4, 1  ;;  %v3642_v17 = vld [vmem:[#allocation16_spill] sm:$0xff]  ;;  %vm1564_vm0 = vcmp.eq.s32.totalorder %v3648_v19, 1 }
 0x248   : > { %v3407_v3 = vsel %vm1033_vm6, %v931_v35, %v779_v61  ;;  %v1406_v51 = vadd.f32 %v2269_v5, %v3391_v40  ;;  %v1670_v11 = vpop.f32.mrf.mxu0  ;;  %vm1559_vm12 = vcmp.eq.s32.totalorder %v3642_v17, 1  ;;  %v3427_v5 = vpop.permute.xlu0 %1803  ;;  %vm1831_vm6 = vcmp.eq.s32.totalorder %v3353_v16, 1  ;;  %v3650_v16 = vld [vmem:[#allocation20_spill] sm:$0xff] }
 0x249   : > { %v1400_v28 = vpop.f32.mrf.mxu1  ;;  %v1671_v7 = vadd.f32 %v3380_v1, %v1670_v11  ;;  %vm1563_vm9 = vcmp.eq.s32.totalorder %v3650_v16, 1  ;;  %v1309_v39 = vsel %vm1293_vm11, %v1151_v55, %v3285_v34 }
 0x24a   : > { %v1576_v35 = vsel %vm1560_vm10, %v1406_v51, %v1306_v44  ;;  %v1401_v52 = vadd.f32 %v3391_v40, %v1400_v28  ;;  %v2304_v61 = vpop.f32.mrf.mxu0  ;;  %vm1834_vm10 = vcmp.eq.s32.totalorder %v3384_v33, 1 }
 0x24b   : > { %v1846_v26 = vsel %vm1830_vm13, %v1676_v43, %v1576_v35  ;;  %v2272_v57 = vpop.f32.mrf.mxu1  ;;  %v1686_v11 = vadd.f32 %v2304_v61, %v3380_v1  ;;  %v3645_v35 = vld [vmem:[#allocation6_spill] sm:$0xff]  ;;  %vm1833_vm13 = vcmp.eq.s32.totalorder %v3399_v31, 1 }
 0x24c   : > { %1862 = vst [vmem:[%s3414_s29 + $0x8] sm:$0xff] %v1846_v26  ;;  %v1575_v51 = vsel %vm1559_vm12, %v1401_v52, %v1305_v30  ;;  %v1416_v44 = vadd.f32 %v2272_v57, %v3391_v40  ;;  %v1680_v18 = vpop.f32.mrf.mxu0  ;;  %vm1295_vm2 = vcmp.eq.s32.totalorder %v3645_v35, 1  ;;  %v3647_v26 = vld [vmem:[#allocation7_spill] sm:$0xff]  ;;  %v3466_v21 = vpop.permute.xlu0 %1809  ;;  %v3654_v31 = vld [vmem:[#allocation22_spill] sm:$0xff] }
 0x24d   : > { %v1845_v43 = vsel %vm1829_vm1, %v1671_v7, %v1575_v51  ;;  %v1410_v28 = vpop.f32.mrf.mxu1  ;;  %v1681_v17 = vadd.f32 %v3380_v1, %v1680_v18  ;;  %vm1298_vm5 = vcmp.eq.s32.totalorder %v3647_v26, 1  ;;  %v3649_v18 = vld [vmem:[#allocation8_spill] sm:$0xff]  ;;  %vm1836_vm1 = vcmp.eq.s32.totalorder %v3427_v5, 1  ;;  %v3656_v5 = vld [vmem:[#allocation23_spill] sm:$0xff] }
 0x24e   : > { %1861 = vst [vmem:[%s3414_s29] sm:$0xff] %v1845_v43  ;;  %v1578_v52 = vsel %vm1562_vm15, %v1416_v44, %v1308_v25  ;;  %v1411_v36 = vadd.f32 %v3391_v40, %v1410_v28  ;;  %v2307_v50 = vpop.f32.mrf.mxu0  ;;  %vm1297_vm8 = vcmp.eq.s32.totalorder %v3649_v18, 1  ;;  %v1161_v43 = vadd.f32 %v3361_v38, %v3288_v48 }
 0x24f   : > { %v1848_v7 = vsel %vm1832_vm4, %v1686_v11, %v1578_v52  ;;  %v2275_v61 = vpop.f32.mrf.mxu1  ;;  %v1696_v30 = vadd.f32 %v2307_v50, %v3380_v1  ;;  %v3652_v52 = vld [vmem:[#allocation21_spill] sm:$0xff]  ;;  %v1312_v48 = vsel %vm1296_vm14, %v1166_v12, %v3296_v22  ;;  %v1176_v50 = vadd.f32 %v3299_v53, %v3361_v38  ;;  %v3655_v12 = vld [vmem:[#allocation11_spill] sm:$0xff] }
 0x250   : > { %1864 = vst [vmem:[%s3414_s29 + $0x18] sm:$0xff] %v1848_v7  ;;  %v1577_v57 = vsel %vm1561_vm3, %v1411_v36, %v1307_v49  ;;  %v1426_v62 = vadd.f32 %v2275_v61, %v3391_v40  ;;  %v1690_v27 = vpop.f32.mrf.mxu0  ;;  %vm1566_vm12 = vcmp.eq.s32.totalorder %v3652_v52, 1  ;;  %v3653_v61 = vld [vmem:[#allocation10_spill] sm:$0xff]  ;;  %vm1565_vm15 = vcmp.eq.s32.totalorder %v3654_v31, 1  ;;  %v1816_v22 = vpop.permute.xlu0 %1815 }
 0x251   : > { %v1847_v11 = vsel %vm1831_vm6, %v1681_v17, %v1577_v57  ;;  %v1420_v51 = vpop.f32.mrf.mxu1  ;;  %v1691_v44 = vadd.f32 %v3380_v1, %v1690_v27  ;;  %vm1299_vm11 = vcmp.eq.s32.totalorder %v3653_v61, 1  ;;  %v1311_v53 = vsel %vm1295_vm2, %v1161_v43, %v3305_v15 }
 0x252   : > { %1863 = vst [vmem:[%s3414_s29 + $0x10] sm:$0xff] %v1847_v11  ;;  %v1580_v25 = vsel %vm1564_vm0, %v1426_v62, %v1310_v58  ;;  %v1421_v45 = vadd.f32 %v3391_v40, %v1420_v51  ;;  %v2310_v24 = vpop.f32.mrf.mxu0  ;;  %v1171_v57 = vadd.f32 %v3361_v38, %v3308_v47  ;;  %vm1302_vm14 = vcmp.eq.s32.totalorder %v3655_v12, 1  ;;  %v1813_v51 = vpop.permute.xlu1 %1812 }
 0x253   : > { %v1850_v28 = vsel %vm1834_vm10, %v1696_v30, %v1580_v25  ;;  %v2278_v17 = vpop.f32.mrf.mxu1  ;;  %v1706_v33 = vadd.f32 %v2310_v24, %v3380_v1  ;;  %vm1568_vm3 = vcmp.eq.s32.totalorder %v3656_v5, 1  ;;  %vm1835_vm4 = vcmp.eq.s32.totalorder %v3440_v9, 1  ;;  %v3658_v24 = vld [vmem:[#allocation24_spill] sm:$0xff] }
 0x254   : > { %1866 = vst [vmem:[%s3414_s29 + $0x28] sm:$0xff] %v1850_v28  ;;  %v1579_v36 = vsel %vm1563_vm9, %v1421_v45, %v1309_v39  ;;  %v1436_v34 = vadd.f32 %v2278_v17, %v3391_v40  ;;  %v1700_v4 = vpop.f32.mrf.mxu0  ;;  %v1314_v47 = vsel %vm1298_vm5, %v1176_v50, %v3316_v6  ;;  %v3657_v45 = vld [vmem:[#allocation12_spill] sm:$0xff]  ;;  %vm1567_vm0 = vcmp.eq.s32.totalorder %v3658_v24, 1 }
 0x255   : > { %v1849_v49 = vsel %vm1833_vm13, %v1691_v44, %v1579_v36  ;;  %v1430_v55 = vpop.f32.mrf.mxu1  ;;  %v1701_v7 = vadd.f32 %v3380_v1, %v1700_v4  ;;  %v1186_v44 = vadd.f32 %v3319_v60, %v3361_v38  ;;  %vm1301_vm2 = vcmp.eq.s32.totalorder %v3657_v45, 1  ;;  %v1822_v4 = vpop.permute.xlu0 %1821 }
 0x256   : > { %1865 = vst [vmem:[%s3414_s29 + $0x20] sm:$0xff] %v1849_v49  ;;  %v1582_v30 = vsel %vm1566_vm12, %v1436_v34, %v1312_v48  ;;  %v1431_v19 = vadd.f32 %v3391_v40, %v1430_v55  ;;  %v2313_v42 = vpop.f32.mrf.mxu0  ;;  %vm1838_vm6 = vcmp.eq.s32.totalorder %v3466_v21, 1  ;;  %v1313_v60 = vsel %vm1297_vm8, %v1171_v57, %v3327_v29  ;;  %v3659_v21 = vld [vmem:[#allocation25_spill] sm:$0xff]  ;;  %v3660_v49 = vld [vmem:[#allocation26_spill] sm:$0xff]  ;;  %v1819_v31 = vpop.permute.xlu1 %1818 }
 0x257   : > { %v1852_v62 = vsel %vm1836_vm1, %v1706_v33, %v1582_v30  ;;  %v2281_v27 = vpop.f32.mrf.mxu1  ;;  %v1716_v58 = vadd.f32 %v2313_v42, %v3380_v1  ;;  %v1181_v43 = vadd.f32 %v3361_v38, %v3330_v13  ;;  %vm1570_vm5 = vcmp.eq.s32.totalorder %v3659_v21, 1 }
 0x258   : > { %1868 = vst [vmem:[%s3414_s29 + $0x38] sm:$0xff] %v1852_v62  ;;  %v1581_v11 = vsel %vm1565_vm15, %v1431_v19, %v1311_v53  ;;  %v1446_v15 = vadd.f32 %v2281_v27, %v3391_v40  ;;  %v1710_v35 = vpop.f32.mrf.mxu0  ;;  %vm1837_vm9 = vcmp.eq.s32.totalorder %v3481_v10, 1  ;;  %v1316_v29 = vsel %vm1300_vm7, %v1186_v44, %v3336_v0 }
 0x259   : > { %v1851_v16 = vsel %vm1835_vm4, %v1701_v7, %v1581_v11  ;;  %v1440_v25 = vpop.f32.mrf.mxu1  ;;  %v1711_v9 = vadd.f32 %v3380_v1, %v1710_v35  ;;  %v1196_v13 = vadd.f32 %v3339_v63, %v3361_v38  ;;  %vm1569_vm8 = vcmp.eq.s32.totalorder %v3660_v49, 1  ;;  %v1828_v5 = vpop.permute.xlu0 %1827 }
 0x25a   : > { %1867 = vst [vmem:[%s3414_s29 + $0x30] sm:$0xff] %v1851_v16  ;;  %v1584_v39 = vsel %vm1568_vm3, %v1446_v15, %v1314_v47  ;;  %v1441_v6 = vadd.f32 %v3391_v40, %v1440_v25  ;;  %v2316_v26 = vpop.f32.mrf.mxu0  ;;  %vm1840_vm10 = vcmp.eq.s32.totalorder %v1816_v22, 1  ;;  %v1315_v0 = vsel %vm1299_vm11, %v1181_v43, %v3347_v37  ;;  %v3662_v25 = vld [vmem:[#allocation14_spill] sm:$0xff] }
 0x25b   : > { %v1854_v28 = vsel %vm1838_vm6, %v1716_v58, %v1584_v39  ;;  %v2284_v17 = vpop.f32.mrf.mxu1  ;;  %v1726_v33 = vadd.f32 %v2316_v26, %v3380_v1  ;;  %v1191_v63 = vadd.f32 %v3361_v38, %v3350_v14  ;;  %vm1572_vm7 = vcmp.eq.s32.totalorder %v3253_v54, 1 }
 0x25c   : > { %1870 = vst [vmem:[%s3414_s29 + $0x48] sm:$0xff] %v1854_v28  ;;  %v1583_v52 = vsel %vm1567_vm0, %v1441_v6, %v1313_v60  ;;  %v1456_v36 = vadd.f32 %v2284_v17, %v3391_v40  ;;  %v1720_v34 = vpop.f32.mrf.mxu0  ;;  %vm1839_vm12 = vcmp.eq.s32.totalorder %v1813_v51, 1  ;;  %v1318_v37 = vsel %vm1302_vm14, %v1196_v13, %v3363_v41 }
 0x25d   : > { %v1853_v18 = vsel %vm1837_vm9, %v1711_v9, %v1583_v52  ;;  %v1450_v48 = vpop.f32.mrf.mxu1  ;;  %v1721_v50 = vadd.f32 %v3380_v1, %v1720_v34  ;;  %v1206_v14 = vadd.f32 %v3366_v8, %v3361_v38  ;;  %vm1571_vm13 = vcmp.eq.s32.totalorder %v3263_v20, 1  ;;  %v3661_v20 = vld [vmem:[#allocation13_spill] sm:$0xff] }
 0x25e   : > { %1869 = vst [vmem:[%s3414_s29 + $0x40] sm:$0xff] %v1853_v18  ;;  %v1586_v10 = vsel %vm1570_vm5, %v1456_v36, %v1316_v29  ;;  %v1451_v55 = vadd.f32 %v3391_v40, %v1450_v48  ;;  %v2319_v7 = vpop.f32.mrf.mxu0  ;;  %vm1842_vm11 = vcmp.eq.s32.totalorder %v1822_v4, 1  ;;  %v1317_v41 = vsel %vm1301_vm2, %v1191_v63, %v3372_v46  ;;  %v1825_v46 = vpop.permute.xlu1 %1824 }
 0x25f   : > { %v1856_v59 = vsel %vm1840_vm10, %v1726_v33, %v1586_v10  ;;  %v2287_v30 = vpop.f32.mrf.mxu1  ;;  %v1736_v19 = vadd.f32 %v2319_v7, %v3380_v1  ;;  %v1201_v8 = vadd.f32 %v3361_v38, %v3375_v2  ;;  %vm1304_vm15 = vcmp.eq.s32.totalorder %v3661_v20, 1 }
 0x260   : > { %1872 = vst [vmem:[%s3414_s29 + $0x58] sm:$0xff] %v1856_v59  ;;  %v1585_v42 = vsel %vm1569_vm8, %v1451_v55, %v1315_v0  ;;  %v1466_v22 = vadd.f32 %v2287_v30, %v3391_v40  ;;  %v1730_v53 = vpop.f32.mrf.mxu0  ;;  %vm1841_vm1 = vcmp.eq.s32.totalorder %v1819_v31, 1  ;;  %vm1574_vm14 = vcmp.eq.s32.totalorder %v3281_v32, 1 }
 0x261   : > { %v1855_v61 = vsel %vm1839_vm12, %v1721_v50, %v1585_v42  ;;  %v1460_v57 = vpop.f32.mrf.mxu1  ;;  %v1731_v62 = vadd.f32 %v3380_v1, %v1730_v53  ;;  %v1320_v44 = vsel %vm1304_vm15, %v1206_v14, %v3395_v56  ;;  %vm1303_vm3 = vcmp.eq.s32.totalorder %v3662_v25, 1 }
 0x262   : > { %1871 = vst [vmem:[%s3414_s29 + $0x50] sm:$0xff] %v1855_v61  ;;  %v1588_v54 = vsel %vm1572_vm7, %v1466_v22, %v1318_v37  ;;  %v1461_v27 = vadd.f32 %v3391_v40, %v1460_v57  ;;  %v2322_v58 = vpop.f32.mrf.mxu0  ;;  %vm1844_vm4 = vcmp.eq.s32.totalorder %v1828_v5, 1  ;;  %vm1573_vm2 = vcmp.eq.s32.totalorder %v3291_v23, 1 }
 0x263   : > { %v1858_v12 = vsel %vm1842_vm11, %v1736_v19, %v1588_v54  ;;  %v2290_v11 = vpop.f32.mrf.mxu1  ;;  %v1746_v15 = vadd.f32 %v2322_v58, %v3380_v1  ;;  %v1319_v24 = vsel %vm1303_vm3, %v1201_v8, %v3407_v3  ;;  %vm1843_vm0 = vcmp.eq.s32.totalorder %v1825_v46, 1 }
 0x264   : > { %1874 = vst [vmem:[%s3414_s29 + $0x68] sm:$0xff] %v1858_v12  ;;  %v1587_v35 = vsel %vm1571_vm13, %v1461_v27, %v1317_v41  ;;  %v1476_v51 = vadd.f32 %v2290_v11, %v3391_v40  ;;  %v1740_v47 = vpop.f32.mrf.mxu0 }
 0x265   : > { %v1857_v38 = vsel %vm1841_vm1, %v1731_v62, %v1587_v35  ;;  %v1470_v2 = vpop.f32.mrf.mxu1  ;;  %v1741_v16 = vadd.f32 %v3380_v1, %v1740_v47 }
 0x266   : > { %1873 = vst [vmem:[%s3414_s29 + $0x60] sm:$0xff] %v1857_v38  ;;  %v1590_v9 = vsel %vm1574_vm14, %v1476_v51, %v1320_v44  ;;  %v1471_v45 = vadd.f32 %v3391_v40, %v1470_v2 }
 0x267   : > { %v1860_v32 = vsel %vm1844_vm4, %v1746_v15, %v1590_v9 }
 0x268   : > { %1876 = vst [vmem:[%s3414_s29 + $0x78] sm:$0xff] %v1860_v32  ;;  %v1589_v56 = vsel %vm1573_vm2, %v1471_v45, %v1319_v24 }
 0x269   : > { %v1859_v39 = vsel %vm1843_vm0, %v1741_v16, %v1589_v56 }
 0x26a   : > { %1875 = vst [vmem:[%s3414_s29 + $0x70] sm:$0xff] %v1859_v39 }
 0x26b PF: > { %s14_s15 = sadd.s32 1, %s2380_s15  }
 0x26c   : > { %p11_p4 = scmp.ge.s32.totalorder %s14_s15, 5  }
 0x26e   :  { %13 = sbr.rel (!%p11_p4) target bundleno = 1 (0x1), region = 77 }

</bundles_post_ra>
